<compile_context>
chip_gen: v7x
topology: tpu7x:2x2x1
jax: 0.10.0
libtpu: 0.0.40
codegen_flags: <defaults>
</compile_context>

<pallas_src>
import functools

import jax
import jax.numpy as jnp
from jax import lax
from jax.experimental import pallas as pl
from jax.experimental.pallas import tpu as pltpu


def _round_up(n, m):
    return ((n + m - 1) // m) * m


# ----------------------------------------------------------------------------
# Fused kernel: [ques+ans encoder RNN] -> [decoder RNN] -> [Luong attention]
# ----------------------------------------------------------------------------
def _nmt_fused_kernel(lens_ref, xenc_ref, xdec_ref, enc_whh_ref, dec_whh_ref,
                      wa_ref, wc_ref, wr_ref, bout_ref,
                      dec_ref, attn_ref, mem_scr, *, B, Sq, Sa):
    # lens_ref : (B,) int32 in SMEM        memory_lengths_final
    # xenc_ref : (Tmax, 2B, Hp)            pre-projected encoder inputs
    #                                      (rows [:B] = ques, rows [B:] = ans)
    # xdec_ref : (Tt, B, Hp)               pre-projected decoder inputs
    # enc/dec_whh, wa, wc, wr : (Hp, Hp)   recurrent / attention weights (padded)
    # bout_ref : (1, Hp)                   linear_out bias (padded)
    # dec_ref  : (B*Tt, Hp)                attentional hidden states (lane-dense)
    # attn_ref : (B*Tt, S_pad)             attention distributions (lane-dense)
    # mem_scr  : (B*S_pad, Hp) VMEM        batch-major, lane-padded memory bank
    Tmax = xenc_ref.shape[0]
    Hp = xenc_ref.shape[2]
    Tt = xdec_ref.shape[0]
    S_pad = attn_ref.shape[1]

    # Padded memory-bank rows must be exact zeros (they are masked anyway and
    # the wrapper slices outputs back to the true H / S_total).
    mem_scr[...] = jnp.zeros_like(mem_scr)

    enc_whh = enc_whh_ref[...]          # hoisted loop-invariant weight loads
    dec_whh = dec_whh_ref[...]

    # ---- merged ques/ans encoder: one 2B-row tanh recurrence, vreg carry ----
    h = jnp.zeros((2 * B, Hp), jnp.float32)
    hq_rows, ha_rows = [], []
    h_q_final = h[:B, :]
    h_a_final = h[B:, :]
    for t in range(Tmax):               # static unroll: short, fixed trip count
        h = jnp.tanh(xenc_ref[t]
                     + jnp.dot(h, enc_whh, preferred_element_type=jnp.float32))
        if t < Sq:
            hq_rows.append(h[:B, :])
        if t < Sa:
            ha_rows.append(h[B:, :])
        if t == Sq - 1:
            h_q_final = h[:B, :]
        if t == Sa - 1:
            h_a_final = h[B:, :]

    # memory_bank_final = cat([mem_q, mem_a], time), stored batch-major and
    # lane-padded: rows [b*S_pad, b*S_pad + Sq + Sa) hold batch element b.
    for b in range(B):
        mem_scr[b * S_pad:b * S_pad + Sq, :] = jnp.concatenate(
            [r[b:b + 1, :] for r in hq_rows], axis=0)
        mem_scr[b * S_pad + Sq:b * S_pad + Sq + Sa, :] = jnp.concatenate(
            [r[b:b + 1, :] for r in ha_rows], axis=0)

    # ---- decoder RNN, init state = enc_state_ques + enc_state_ans -----------
    hd = h_q_final + h_a_final
    dec_rows = []
    for t in range(Tt):                 # static unroll, vreg-resident carry
        hd = jnp.tanh(xdec_ref[t]
                      + jnp.dot(hd, dec_whh, preferred_element_type=jnp.float32))
        dec_rows.append(hd)
    # batch-major flattened (B*Tt, Hp) slab -> lane-dense projections & stores
    rnn_flat = jnp.concatenate(
        [r[b:b + 1, :] for b in range(B) for r in dec_rows], axis=0)

    # ---- Luong "general" attention over the concatenated memory bank --------
    # query projection batched over all B*Tt rows at once
    q_flat = jnp.dot(rnn_flat, wa_ref[...], preferred_element_type=jnp.float32)
    pos = lax.broadcasted_iota(jnp.int32, (Tt, S_pad), 1)    # hoisted mask iota

    ctx_parts = []
    for b in range(B):                  # per-b scores/ctx: memory bank differs per b
        mem_b = mem_scr[b * S_pad:(b + 1) * S_pad, :]        # (S_pad, Hp)
        q_b = q_flat[b * Tt:(b + 1) * Tt, :]                 # (Tt, Hp)
        # contract on H of both operands -> no in-kernel transpose of mem_b
        scores = lax.dot_general(q_b, mem_b, (((1,), (1,)), ((), ())),
                                 preferred_element_type=jnp.float32)  # (Tt,S_pad)
        scores = jnp.where(pos < lens_ref[b], scores, jnp.float32(-1e30))
        m = jnp.max(scores, axis=-1, keepdims=True)
        e = jnp.exp(scores - m)
        denom = jnp.sum(e, axis=-1, keepdims=True)
        attn_b = e * pl.reciprocal(denom, approx=True)       # EUP slot, VALU-free
        ctx_parts.append(jnp.dot(attn_b, mem_b,
                                 preferred_element_type=jnp.float32))  # (Tt, Hp)
        attn_ref[b * Tt:(b + 1) * Tt, :] = attn_b            # full-lane store
    ctx_flat = jnp.concatenate(ctx_parts, axis=0)            # (B*Tt, Hp)

    # linear_out([ctx; rnn]) + tanh, batched over all B*Tt rows, one full store
    dec_ref[...] = jnp.tanh(
        jnp.dot(ctx_flat, wc_ref[...], preferred_element_type=jnp.float32)
        + jnp.dot(rnn_flat, wr_ref[...], preferred_element_type=jnp.float32)
        + bout_ref[...])


# ----------------------------------------------------------------------------
# NMTModel.forward
# ----------------------------------------------------------------------------
def nmt_forward(params, src, ans, tgt, lengths, ans_lengths, bptt=False):
    """src/ans/tgt: int32 [len, batch, 1]; lengths/ans_lengths: int32 [batch]."""
    H = params["enc_whh"].shape[0]
    B = src.shape[1]
    Hp = _round_up(H, 128)

    tgt = tgt[:-1]                                            # tgt = tgt[:-1]
    Sq, Sa, Tt = src.shape[0], ans.shape[0], tgt.shape[0]
    S_tot = Sq + Sa
    S_pad = _round_up(S_tot, 128)

    # zero-pad weights once so every in-kernel tile is lane-dense (128 lanes);
    # padded hidden dims stay exactly zero through tanh / matmul / softmax.
    padc = lambda w: jnp.pad(w, ((0, 0), (0, Hp - w.shape[1])))
    padrc = lambda w: jnp.pad(w, ((0, Hp - w.shape[0]), (0, Hp - w.shape[1])))
    enc_wih, enc_b = padc(params["enc_wih"]), padc(params["enc_b"])
    dec_wih, dec_b = padc(params["dec_wih"]), padc(params["dec_b"])
    enc_whh, dec_whh = padrc(params["enc_whh"]), padrc(params["dec_whh"])
    wa, wc, wr = padrc(params["attn_wa"]), padrc(params["attn_wc"]), padrc(params["attn_wr"])
    b_out = padc(params["attn_b"])

    # embedding lookup + input projection hoisted out of the recurrence:
    # one tall XLA matmul per sequence (review item #1).
    src_emb = jnp.take(params["enc_emb"], src[:, :, 0], axis=0)       # (Sq,B,E)
    ans_emb = jnp.take(params["enc_emb"], ans[:, :, 0], axis=0)       # (Sa,B,E)
    tgt_emb = jnp.take(params["dec_emb"], tgt[:, :, 0], axis=0)       # (Tt,B,E)
    xq = jnp.einsum("tbe,eh->tbh", src_emb, enc_wih) + enc_b
    xa = jnp.einsum("tbe,eh->tbh", ans_emb, enc_wih) + enc_b
    xt = jnp.einsum("tbe,eh->tbh", tgt_emb, dec_wih) + dec_b

    # merge the two (weight-shared, independent) encoder calls into one
    # 2B-row recurrence: rows [:B] = ques, rows [B:] = ans (time zero-padded).
    Tmax = max(Sq, Sa)
    xq = jnp.pad(xq, ((0, Tmax - Sq), (0, 0), (0, 0)))
    xa = jnp.pad(xa, ((0, Tmax - Sa), (0, 0), (0, 0)))
    x_enc = jnp.concatenate([xq, xa], axis=1)                         # (Tmax,2B,Hp)

    # memory_lengths_final = ques_lengths + ans_lengths
    mem_lengths = (lengths + ans_lengths).astype(jnp.int32)

    kernel = functools.partial(_nmt_fused_kernel, B=B, Sq=Sq, Sa=Sa)
    dec_flat, attn_flat = pl.pallas_call(
        kernel,
        grid=(1,),
        in_specs=[
            pl.BlockSpec(memory_space=pltpu.MemorySpace.SMEM),        # lengths
            pl.BlockSpec((Tmax, 2 * B, Hp), lambda i: (0, 0, 0)),
            pl.BlockSpec((Tt, B, Hp), lambda i: (0, 0, 0)),
            pl.BlockSpec((Hp, Hp), lambda i: (0, 0)),
            pl.BlockSpec((Hp, Hp), lambda i: (0, 0)),
            pl.BlockSpec((Hp, Hp), lambda i: (0, 0)),
            pl.BlockSpec((Hp, Hp), lambda i: (0, 0)),
            pl.BlockSpec((Hp, Hp), lambda i: (0, 0)),
            pl.BlockSpec((1, Hp), lambda i: (0, 0)),
        ],
        out_specs=(
            pl.BlockSpec((B * Tt, Hp), lambda i: (0, 0)),
            pl.BlockSpec((B * Tt, S_pad), lambda i: (0, 0)),
        ),
        out_shape=(
            jax.ShapeDtypeStruct((B * Tt, Hp), jnp.float32),
            jax.ShapeDtypeStruct((B * Tt, S_pad), jnp.float32),
        ),
        scratch_shapes=[pltpu.VMEM((B * S_pad, Hp), jnp.float32)],
    )(mem_lengths, x_enc, xt, enc_whh, dec_whh, wa, wc, wr, b_out)

    # back to the module's time-major [tgt_len-1, B, ...] layout, drop padding
    dec_out = jnp.transpose(dec_flat.reshape(B, Tt, Hp)[:, :, :H], (1, 0, 2))
    attn = jnp.transpose(attn_flat.reshape(B, Tt, S_pad)[:, :, :S_tot], (1, 0, 2))
    return dec_out, {"std": attn}


# ----------------------------------------------------------------------------
# Pure-JAX reference (same semantics) for correctness checking
# ----------------------------------------------------------------------------
def nmt_forward_reference(params, src, ans, tgt, lengths, ans_lengths):
    H = params["enc_whh"].shape[0]
    B = src.shape[1]
    tgt = tgt[:-1]

    def rnn(x_emb, h0, wih, whh, b):
        def step(h, x):
            h_new = jnp.tanh(x @ wih + h @ whh + b)
            return h_new, h_new
        h_T, ys = lax.scan(step, h0, x_emb)
        return ys, h_T

    h0 = jnp.zeros((B, H), jnp.float32)
    src_emb = jnp.take(params["enc_emb"], src[:, :, 0], axis=0)
    ans_emb = jnp.take(params["enc_emb"], ans[:, :, 0], axis=0)
    mem_q, hq = rnn(src_emb, h0, params["enc_wih"], params["enc_whh"], params["enc_b"])
    mem_a, ha = rnn(ans_emb, h0, params["enc_wih"], params["enc_whh"], params["enc_b"])
    mem = jnp.concatenate([mem_q, mem_a], axis=0)                     # (S,B,H)
    mem_len = lengths + ans_lengths

    tgt_emb = jnp.take(params["dec_emb"], tgt[:, :, 0], axis=0)
    rnn_out, _ = rnn(tgt_emb, hq + ha, params["dec_wih"], params["dec_whh"],
                     params["dec_b"])

    q = jnp.einsum("tbh,hk->tbk", rnn_out, params["attn_wa"])
    scores = jnp.einsum("tbk,sbk->tbs", q, mem)
    S = mem.shape[0]
    mask = jnp.arange(S)[None, None, :] < mem_len[None, :, None]
    scores = jnp.where(mask, scores, -1e30)
    attn = jax.nn.softmax(scores, axis=-1)
    ctx = jnp.einsum("tbs,sbh->tbh", attn, mem)
    dec = jnp.tanh(jnp.einsum("tbh,hk->tbk", ctx, params["attn_wc"])
                   + jnp.einsum("tbh,hk->tbk", rnn_out, params["attn_wr"])
                   + params["attn_b"])
    return dec, {"std": attn}


# ----------------------------------------------------------------------------
def make_params(key, vocab, emb, hidden):
    ks = jax.random.split(key, 10)
    n = lambda k, s: (0.1 * jax.random.normal(k, s)).astype(jnp.float32)
    return {
        "enc_emb": n(ks[0], (vocab, emb)),
        "enc_wih": n(ks[1], (emb, hidden)),
        "enc_whh": n(ks[2], (hidden, hidden)),
        "enc_b":   n(ks[3], (1, hidden)),
        "dec_emb": n(ks[4], (vocab, emb)),
        "dec_wih": n(ks[5], (emb, hidden)),
        "dec_whh": n(ks[6], (hidden, hidden)),
        "dec_b":   n(ks[7], (1, hidden)),
        "attn_wa": n(ks[8], (hidden, hidden)),
        # linear_out : Linear(2H, H) split into the context half and rnn half
        "attn_wc": n(ks[9], (hidden, hidden)),
        "attn_wr": n(jax.random.fold_in(key, 99), (hidden, hidden)),
        "attn_b":  jnp.zeros((1, hidden), jnp.float32),
    }


if __name__ == "__main__":
    VOCAB, EMB, HID = 50, 32, 32
    B, SRC_LEN, ANS_LEN, TGT_LEN = 2, 8, 6, 7

    key = jax.random.PRNGKey(0)
    kp, k1, k2, k3 = jax.random.split(key, 4)
    params = make_params(kp, VOCAB, EMB, HID)

    src = jax.random.randint(k1, (SRC_LEN, B, 1), 0, VOCAB, dtype=jnp.int32)
    ans = jax.random.randint(k2, (ANS_LEN, B, 1), 0, VOCAB, dtype=jnp.int32)
    tgt = jax.random.randint(k3, (TGT_LEN, B, 1), 0, VOCAB, dtype=jnp.int32)
    lengths = jnp.array([SRC_LEN, SRC_LEN - 2], jnp.int32)
    ans_lengths = jnp.array([ANS_LEN, ANS_LEN - 2], jnp.int32)

    dec_out, attns = jax.jit(nmt_forward)(params, src, ans, tgt, lengths,
                                          ans_lengths)
    jax.block_until_ready((dec_out, attns))

    assert dec_out.shape == (TGT_LEN - 1, B, HID)
    assert attns["std"].shape == (TGT_LEN - 1, B, SRC_LEN + ANS_LEN)
    # attention rows sum to 1 up to the EUP approx-reciprocal error
    assert bool(jnp.allclose(attns["std"].sum(-1), 1.0, atol=1e-2))

    # compare against the pure-JAX reference (loose tol: approx reciprocal +
    # MXU accumulation-order differences)
    ref_dec, ref_attns = jax.jit(nmt_forward_reference)(
        params, src, ans, tgt, lengths, ans_lengths)
    assert bool(jnp.allclose(dec_out, ref_dec, atol=1e-2))
    assert bool(jnp.allclose(attns["std"], ref_attns["std"], atol=1e-2))
    print("KERNEL_OK")
</pallas_src>

<mosaic_0001>
module attributes {stable_mosaic.version = 11 : i64} {
  func.func @_nmt_fused_kernel(%arg0: i32, %arg1: memref<2xi32, #tpu.memory_space<smem>>, %arg2: memref<8x4x128xf32, #tpu.memory_space<vmem>>, %arg3: memref<6x2x128xf32, #tpu.memory_space<vmem>>, %arg4: memref<128x128xf32, #tpu.memory_space<vmem>>, %arg5: memref<128x128xf32, #tpu.memory_space<vmem>>, %arg6: memref<128x128xf32, #tpu.memory_space<vmem>>, %arg7: memref<128x128xf32, #tpu.memory_space<vmem>>, %arg8: memref<128x128xf32, #tpu.memory_space<vmem>>, %arg9: memref<1x128xf32, #tpu.memory_space<vmem>>, %arg10: memref<12x128xf32, #tpu.memory_space<vmem>>, %arg11: memref<12x128xf32, #tpu.memory_space<vmem>>, %arg12: memref<256x128xf32, #tpu.memory_space<vmem>>) attributes {dimension_semantics = [#tpu.dimension_semantics<arbitrary>], iteration_bounds = array<i64: 1>, scalar_prefetch = 0 : i64, scratch_operands = 1 : i64, tpu.core_type = #tpu.core_type<tc>, window_params = [{transform_indices = @transform_0, window_bounds = array<i64: 2>}, {pipeline_mode = #tpu.pipeline_mode<synchronous>, transform_indices = @transform_1, window_bounds = array<i64: 8, 4, 128>}, {pipeline_mode = #tpu.pipeline_mode<synchronous>, transform_indices = @transform_2, window_bounds = array<i64: 6, 2, 128>}, {pipeline_mode = #tpu.pipeline_mode<synchronous>, transform_indices = @transform_3, window_bounds = array<i64: 128, 128>}, {pipeline_mode = #tpu.pipeline_mode<synchronous>, transform_indices = @transform_4, window_bounds = array<i64: 128, 128>}, {pipeline_mode = #tpu.pipeline_mode<synchronous>, transform_indices = @transform_5, window_bounds = array<i64: 128, 128>}, {pipeline_mode = #tpu.pipeline_mode<synchronous>, transform_indices = @transform_6, window_bounds = array<i64: 128, 128>}, {pipeline_mode = #tpu.pipeline_mode<synchronous>, transform_indices = @transform_7, window_bounds = array<i64: 128, 128>}, {pipeline_mode = #tpu.pipeline_mode<synchronous>, transform_indices = @transform_8, window_bounds = array<i64: 1, 128>}, {pipeline_mode = #tpu.pipeline_mode<synchronous>, transform_indices = @transform_9, window_bounds = array<i64: 12, 128>}, {pipeline_mode = #tpu.pipeline_mode<synchronous>, transform_indices = @transform_10, window_bounds = array<i64: 12, 128>}]} {
    %cst = arith.constant 0.000000e+00 : f32
    %0 = vector.broadcast %cst : f32 to vector<256x128xf32>
    %c0 = arith.constant 0 : index
    %c0_0 = arith.constant 0 : index
    %1 = vector.load %arg12[%c0, %c0_0] : memref<256x128xf32, #tpu.memory_space<vmem>>, vector<256x128xf32>
    tpu.vector_store %arg12[%c0, %c0_0], %0 {strides = array<i32>} : memref<256x128xf32, #tpu.memory_space<vmem>>, vector<256x128xf32>,
    %c0_1 = arith.constant 0 : index
    %c0_2 = arith.constant 0 : index
    %2 = vector.load %arg4[%c0_1, %c0_2] : memref<128x128xf32, #tpu.memory_space<vmem>>, vector<128x128xf32>
    %c0_3 = arith.constant 0 : index
    %c0_4 = arith.constant 0 : index
    %3 = vector.load %arg5[%c0_3, %c0_4] : memref<128x128xf32, #tpu.memory_space<vmem>>, vector<128x128xf32>
    %cst_5 = arith.constant 0.000000e+00 : f32
    %4 = vector.broadcast %cst_5 : f32 to vector<4x128xf32>
    %c0_6 = arith.constant 0 : index
    %c0_7 = arith.constant 0 : index
    %c0_8 = arith.constant 0 : index
    %5 = vector.load %arg2[%c0_6, %c0_7, %c0_8] : memref<8x4x128xf32, #tpu.memory_space<vmem>>, vector<1x4x128xf32>
    %6 = vector.shape_cast %5 : vector<1x4x128xf32> to vector<4x128xf32>
    %cst_9 = arith.constant dense<0.000000e+00> : vector<4x128xf32>
    %7 = tpu.matmul %4, %2, %cst_9 {dimension_numbers = #tpu.dot_dimension_numbers<[1], [0], [0], [1], [0, 0, 1, 1], [], []>} : vector<4x128xf32>, vector<128x128xf32>, vector<4x128xf32> -> vector<4x128xf32>
    %8 = arith.addf %6, %7 : vector<4x128xf32>
    %9 = math.tanh %8 : vector<4x128xf32>
    %10 = vector.extract_strided_slice %9 {offsets = [0, 0], sizes = [2, 128], strides = [1, 1]} : vector<4x128xf32> to vector<2x128xf32>
    %11 = vector.extract_strided_slice %9 {offsets = [2, 0], sizes = [2, 128], strides = [1, 1]} : vector<4x128xf32> to vector<2x128xf32>
    %c1 = arith.constant 1 : index
    %c0_10 = arith.constant 0 : index
    %c0_11 = arith.constant 0 : index
    %12 = vector.load %arg2[%c1, %c0_10, %c0_11] : memref<8x4x128xf32, #tpu.memory_space<vmem>>, vector<1x4x128xf32>
    %13 = vector.shape_cast %12 : vector<1x4x128xf32> to vector<4x128xf32>
    %cst_12 = arith.constant dense<0.000000e+00> : vector<4x128xf32>
    %14 = tpu.matmul %9, %2, %cst_12 {dimension_numbers = #tpu.dot_dimension_numbers<[1], [0], [0], [1], [0, 0, 1, 1], [], []>} : vector<4x128xf32>, vector<128x128xf32>, vector<4x128xf32> -> vector<4x128xf32>
    %15 = arith.addf %13, %14 : vector<4x128xf32>
    %16 = math.tanh %15 : vector<4x128xf32>
    %17 = vector.extract_strided_slice %16 {offsets = [0, 0], sizes = [2, 128], strides = [1, 1]} : vector<4x128xf32> to vector<2x128xf32>
    %18 = vector.extract_strided_slice %16 {offsets = [2, 0], sizes = [2, 128], strides = [1, 1]} : vector<4x128xf32> to vector<2x128xf32>
    %c2 = arith.constant 2 : index
    %c0_13 = arith.constant 0 : index
    %c0_14 = arith.constant 0 : index
    %19 = vector.load %arg2[%c2, %c0_13, %c0_14] : memref<8x4x128xf32, #tpu.memory_space<vmem>>, vector<1x4x128xf32>
    %20 = vector.shape_cast %19 : vector<1x4x128xf32> to vector<4x128xf32>
    %cst_15 = arith.constant dense<0.000000e+00> : vector<4x128xf32>
    %21 = tpu.matmul %16, %2, %cst_15 {dimension_numbers = #tpu.dot_dimension_numbers<[1], [0], [0], [1], [0, 0, 1, 1], [], []>} : vector<4x128xf32>, vector<128x128xf32>, vector<4x128xf32> -> vector<4x128xf32>
    %22 = arith.addf %20, %21 : vector<4x128xf32>
    %23 = math.tanh %22 : vector<4x128xf32>
    %24 = vector.extract_strided_slice %23 {offsets = [0, 0], sizes = [2, 128], strides = [1, 1]} : vector<4x128xf32> to vector<2x128xf32>
    %25 = vector.extract_strided_slice %23 {offsets = [2, 0], sizes = [2, 128], strides = [1, 1]} : vector<4x128xf32> to vector<2x128xf32>
    %c3 = arith.constant 3 : index
    %c0_16 = arith.constant 0 : index
    %c0_17 = arith.constant 0 : index
    %26 = vector.load %arg2[%c3, %c0_16, %c0_17] : memref<8x4x128xf32, #tpu.memory_space<vmem>>, vector<1x4x128xf32>
    %27 = vector.shape_cast %26 : vector<1x4x128xf32> to vector<4x128xf32>
    %cst_18 = arith.constant dense<0.000000e+00> : vector<4x128xf32>
    %28 = tpu.matmul %23, %2, %cst_18 {dimension_numbers = #tpu.dot_dimension_numbers<[1], [0], [0], [1], [0, 0, 1, 1], [], []>} : vector<4x128xf32>, vector<128x128xf32>, vector<4x128xf32> -> vector<4x128xf32>
    %29 = arith.addf %27, %28 : vector<4x128xf32>
    %30 = math.tanh %29 : vector<4x128xf32>
    %31 = vector.extract_strided_slice %30 {offsets = [0, 0], sizes = [2, 128], strides = [1, 1]} : vector<4x128xf32> to vector<2x128xf32>
    %32 = vector.extract_strided_slice %30 {offsets = [2, 0], sizes = [2, 128], strides = [1, 1]} : vector<4x128xf32> to vector<2x128xf32>
    %c4 = arith.constant 4 : index
    %c0_19 = arith.constant 0 : index
    %c0_20 = arith.constant 0 : index
    %33 = vector.load %arg2[%c4, %c0_19, %c0_20] : memref<8x4x128xf32, #tpu.memory_space<vmem>>, vector<1x4x128xf32>
    %34 = vector.shape_cast %33 : vector<1x4x128xf32> to vector<4x128xf32>
    %cst_21 = arith.constant dense<0.000000e+00> : vector<4x128xf32>
    %35 = tpu.matmul %30, %2, %cst_21 {dimension_numbers = #tpu.dot_dimension_numbers<[1], [0], [0], [1], [0, 0, 1, 1], [], []>} : vector<4x128xf32>, vector<128x128xf32>, vector<4x128xf32> -> vector<4x128xf32>
    %36 = arith.addf %34, %35 : vector<4x128xf32>
    %37 = math.tanh %36 : vector<4x128xf32>
    %38 = vector.extract_strided_slice %37 {offsets = [0, 0], sizes = [2, 128], strides = [1, 1]} : vector<4x128xf32> to vector<2x128xf32>
    %39 = vector.extract_strided_slice %37 {offsets = [2, 0], sizes = [2, 128], strides = [1, 1]} : vector<4x128xf32> to vector<2x128xf32>
    %c5 = arith.constant 5 : index
    %c0_22 = arith.constant 0 : index
    %c0_23 = arith.constant 0 : index
    %40 = vector.load %arg2[%c5, %c0_22, %c0_23] : memref<8x4x128xf32, #tpu.memory_space<vmem>>, vector<1x4x128xf32>
    %41 = vector.shape_cast %40 : vector<1x4x128xf32> to vector<4x128xf32>
    %cst_24 = arith.constant dense<0.000000e+00> : vector<4x128xf32>
    %42 = tpu.matmul %37, %2, %cst_24 {dimension_numbers = #tpu.dot_dimension_numbers<[1], [0], [0], [1], [0, 0, 1, 1], [], []>} : vector<4x128xf32>, vector<128x128xf32>, vector<4x128xf32> -> vector<4x128xf32>
    %43 = arith.addf %41, %42 : vector<4x128xf32>
    %44 = math.tanh %43 : vector<4x128xf32>
    %45 = vector.extract_strided_slice %44 {offsets = [0, 0], sizes = [2, 128], strides = [1, 1]} : vector<4x128xf32> to vector<2x128xf32>
    %46 = vector.extract_strided_slice %44 {offsets = [2, 0], sizes = [2, 128], strides = [1, 1]} : vector<4x128xf32> to vector<2x128xf32>
    %47 = vector.extract_strided_slice %44 {offsets = [2, 0], sizes = [2, 128], strides = [1, 1]} : vector<4x128xf32> to vector<2x128xf32>
    %c6 = arith.constant 6 : index
    %c0_25 = arith.constant 0 : index
    %c0_26 = arith.constant 0 : index
    %48 = vector.load %arg2[%c6, %c0_25, %c0_26] : memref<8x4x128xf32, #tpu.memory_space<vmem>>, vector<1x4x128xf32>
    %49 = vector.shape_cast %48 : vector<1x4x128xf32> to vector<4x128xf32>
    %cst_27 = arith.constant dense<0.000000e+00> : vector<4x128xf32>
    %50 = tpu.matmul %44, %2, %cst_27 {dimension_numbers = #tpu.dot_dimension_numbers<[1], [0], [0], [1], [0, 0, 1, 1], [], []>} : vector<4x128xf32>, vector<128x128xf32>, vector<4x128xf32> -> vector<4x128xf32>
    %51 = arith.addf %49, %50 : vector<4x128xf32>
    %52 = math.tanh %51 : vector<4x128xf32>
    %53 = vector.extract_strided_slice %52 {offsets = [0, 0], sizes = [2, 128], strides = [1, 1]} : vector<4x128xf32> to vector<2x128xf32>
    %c7 = arith.constant 7 : index
    %c0_28 = arith.constant 0 : index
    %c0_29 = arith.constant 0 : index
    %54 = vector.load %arg2[%c7, %c0_28, %c0_29] : memref<8x4x128xf32, #tpu.memory_space<vmem>>, vector<1x4x128xf32>
    %55 = vector.shape_cast %54 : vector<1x4x128xf32> to vector<4x128xf32>
    %cst_30 = arith.constant dense<0.000000e+00> : vector<4x128xf32>
    %56 = tpu.matmul %52, %2, %cst_30 {dimension_numbers = #tpu.dot_dimension_numbers<[1], [0], [0], [1], [0, 0, 1, 1], [], []>} : vector<4x128xf32>, vector<128x128xf32>, vector<4x128xf32> -> vector<4x128xf32>
    %57 = arith.addf %55, %56 : vector<4x128xf32>
    %58 = math.tanh %57 : vector<4x128xf32>
    %59 = vector.extract_strided_slice %58 {offsets = [0, 0], sizes = [2, 128], strides = [1, 1]} : vector<4x128xf32> to vector<2x128xf32>
    %60 = vector.extract_strided_slice %58 {offsets = [0, 0], sizes = [2, 128], strides = [1, 1]} : vector<4x128xf32> to vector<2x128xf32>
    %61 = vector.extract_strided_slice %10 {offsets = [0, 0], sizes = [1, 128], strides = [1, 1]} : vector<2x128xf32> to vector<1x128xf32>
    %62 = vector.extract_strided_slice %17 {offsets = [0, 0], sizes = [1, 128], strides = [1, 1]} : vector<2x128xf32> to vector<1x128xf32>
    %63 = vector.extract_strided_slice %24 {offsets = [0, 0], sizes = [1, 128], strides = [1, 1]} : vector<2x128xf32> to vector<1x128xf32>
    %64 = vector.extract_strided_slice %31 {offsets = [0, 0], sizes = [1, 128], strides = [1, 1]} : vector<2x128xf32> to vector<1x128xf32>
    %65 = vector.extract_strided_slice %38 {offsets = [0, 0], sizes = [1, 128], strides = [1, 1]} : vector<2x128xf32> to vector<1x128xf32>
    %66 = vector.extract_strided_slice %45 {offsets = [0, 0], sizes = [1, 128], strides = [1, 1]} : vector<2x128xf32> to vector<1x128xf32>
    %67 = vector.extract_strided_slice %53 {offsets = [0, 0], sizes = [1, 128], strides = [1, 1]} : vector<2x128xf32> to vector<1x128xf32>
    %68 = vector.extract_strided_slice %59 {offsets = [0, 0], sizes = [1, 128], strides = [1, 1]} : vector<2x128xf32> to vector<1x128xf32>
    %69 = tpu.concatenate %61, %62, %63, %64, %65, %66, %67, %68 in 0 : vector<1x128xf32>, vector<1x128xf32>, vector<1x128xf32>, vector<1x128xf32>, vector<1x128xf32>, vector<1x128xf32>, vector<1x128xf32>, vector<1x128xf32> -> vector<8x128xf32>
    %c0_31 = arith.constant 0 : index
    %c0_32 = arith.constant 0 : index
    %70 = vector.load %arg12[%c0_31, %c0_32] : memref<256x128xf32, #tpu.memory_space<vmem>>, vector<8x128xf32>
    tpu.vector_store %arg12[%c0_31, %c0_32], %69 {strides = array<i32>} : memref<256x128xf32, #tpu.memory_space<vmem>>, vector<8x128xf32>,
    %71 = vector.extract_strided_slice %11 {offsets = [0, 0], sizes = [1, 128], strides = [1, 1]} : vector<2x128xf32> to vector<1x128xf32>
    %72 = vector.extract_strided_slice %18 {offsets = [0, 0], sizes = [1, 128], strides = [1, 1]} : vector<2x128xf32> to vector<1x128xf32>
    %73 = vector.extract_strided_slice %25 {offsets = [0, 0], sizes = [1, 128], strides = [1, 1]} : vector<2x128xf32> to vector<1x128xf32>
    %74 = vector.extract_strided_slice %32 {offsets = [0, 0], sizes = [1, 128], strides = [1, 1]} : vector<2x128xf32> to vector<1x128xf32>
    %75 = vector.extract_strided_slice %39 {offsets = [0, 0], sizes = [1, 128], strides = [1, 1]} : vector<2x128xf32> to vector<1x128xf32>
    %76 = vector.extract_strided_slice %46 {offsets = [0, 0], sizes = [1, 128], strides = [1, 1]} : vector<2x128xf32> to vector<1x128xf32>
    %77 = tpu.concatenate %71, %72, %73, %74, %75, %76 in 0 : vector<1x128xf32>, vector<1x128xf32>, vector<1x128xf32>, vector<1x128xf32>, vector<1x128xf32>, vector<1x128xf32> -> vector<6x128xf32>
    %c8 = arith.constant 8 : index
    %c0_33 = arith.constant 0 : index
    %78 = vector.load %arg12[%c8, %c0_33] : memref<256x128xf32, #tpu.memory_space<vmem>>, vector<6x128xf32>
    tpu.vector_store %arg12[%c8, %c0_33], %77 {strides = array<i32>} : memref<256x128xf32, #tpu.memory_space<vmem>>, vector<6x128xf32>,
    %79 = vector.extract_strided_slice %10 {offsets = [1, 0], sizes = [1, 128], strides = [1, 1]} : vector<2x128xf32> to vector<1x128xf32>
    %80 = vector.extract_strided_slice %17 {offsets = [1, 0], sizes = [1, 128], strides = [1, 1]} : vector<2x128xf32> to vector<1x128xf32>
    %81 = vector.extract_strided_slice %24 {offsets = [1, 0], sizes = [1, 128], strides = [1, 1]} : vector<2x128xf32> to vector<1x128xf32>
    %82 = vector.extract_strided_slice %31 {offsets = [1, 0], sizes = [1, 128], strides = [1, 1]} : vector<2x128xf32> to vector<1x128xf32>
    %83 = vector.extract_strided_slice %38 {offsets = [1, 0], sizes = [1, 128], strides = [1, 1]} : vector<2x128xf32> to vector<1x128xf32>
    %84 = vector.extract_strided_slice %45 {offsets = [1, 0], sizes = [1, 128], strides = [1, 1]} : vector<2x128xf32> to vector<1x128xf32>
    %85 = vector.extract_strided_slice %53 {offsets = [1, 0], sizes = [1, 128], strides = [1, 1]} : vector<2x128xf32> to vector<1x128xf32>
    %86 = vector.extract_strided_slice %59 {offsets = [1, 0], sizes = [1, 128], strides = [1, 1]} : vector<2x128xf32> to vector<1x128xf32>
    %87 = tpu.concatenate %79, %80, %81, %82, %83, %84, %85, %86 in 0 : vector<1x128xf32>, vector<1x128xf32>, vector<1x128xf32>, vector<1x128xf32>, vector<1x128xf32>, vector<1x128xf32>, vector<1x128xf32>, vector<1x128xf32> -> vector<8x128xf32>
    %c128 = arith.constant 128 : index
    %c0_34 = arith.constant 0 : index
    %88 = vector.load %arg12[%c128, %c0_34] : memref<256x128xf32, #tpu.memory_space<vmem>>, vector<8x128xf32>
    tpu.vector_store %arg12[%c128, %c0_34], %87 {strides = array<i32>} : memref<256x128xf32, #tpu.memory_space<vmem>>, vector<8x128xf32>,
    %89 = vector.extract_strided_slice %11 {offsets = [1, 0], sizes = [1, 128], strides = [1, 1]} : vector<2x128xf32> to vector<1x128xf32>
    %90 = vector.extract_strided_slice %18 {offsets = [1, 0], sizes = [1, 128], strides = [1, 1]} : vector<2x128xf32> to vector<1x128xf32>
    %91 = vector.extract_strided_slice %25 {offsets = [1, 0], sizes = [1, 128], strides = [1, 1]} : vector<2x128xf32> to vector<1x128xf32>
    %92 = vector.extract_strided_slice %32 {offsets = [1, 0], sizes = [1, 128], strides = [1, 1]} : vector<2x128xf32> to vector<1x128xf32>
    %93 = vector.extract_strided_slice %39 {offsets = [1, 0], sizes = [1, 128], strides = [1, 1]} : vector<2x128xf32> to vector<1x128xf32>
    %94 = vector.extract_strided_slice %46 {offsets = [1, 0], sizes = [1, 128], strides = [1, 1]} : vector<2x128xf32> to vector<1x128xf32>
    %95 = tpu.concatenate %89, %90, %91, %92, %93, %94 in 0 : vector<1x128xf32>, vector<1x128xf32>, vector<1x128xf32>, vector<1x128xf32>, vector<1x128xf32>, vector<1x128xf32> -> vector<6x128xf32>
    %c136 = arith.constant 136 : index
    %c0_35 = arith.constant 0 : index
    %96 = vector.load %arg12[%c136, %c0_35] : memref<256x128xf32, #tpu.memory_space<vmem>>, vector<6x128xf32>
    tpu.vector_store %arg12[%c136, %c0_35], %95 {strides = array<i32>} : memref<256x128xf32, #tpu.memory_space<vmem>>, vector<6x128xf32>,
    %97 = arith.addf %60, %47 : vector<2x128xf32>
    %c0_36 = arith.constant 0 : index
    %c0_37 = arith.constant 0 : index
    %c0_38 = arith.constant 0 : index
    %98 = vector.load %arg3[%c0_36, %c0_37, %c0_38] : memref<6x2x128xf32, #tpu.memory_space<vmem>>, vector<1x2x128xf32>
    %99 = vector.shape_cast %98 : vector<1x2x128xf32> to vector<2x128xf32>
    %cst_39 = arith.constant dense<0.000000e+00> : vector<2x128xf32>
    %100 = tpu.matmul %97, %3, %cst_39 {dimension_numbers = #tpu.dot_dimension_numbers<[1], [0], [0], [1], [0, 0, 1, 1], [], []>} : vector<2x128xf32>, vector<128x128xf32>, vector<2x128xf32> -> vector<2x128xf32>
    %101 = arith.addf %99, %100 : vector<2x128xf32>
    %102 = math.tanh %101 : vector<2x128xf32>
    %c1_40 = arith.constant 1 : index
    %c0_41 = arith.constant 0 : index
    %c0_42 = arith.constant 0 : index
    %103 = vector.load %arg3[%c1_40, %c0_41, %c0_42] : memref<6x2x128xf32, #tpu.memory_space<vmem>>, vector<1x2x128xf32>
    %104 = vector.shape_cast %103 : vector<1x2x128xf32> to vector<2x128xf32>
    %cst_43 = arith.constant dense<0.000000e+00> : vector<2x128xf32>
    %105 = tpu.matmul %102, %3, %cst_43 {dimension_numbers = #tpu.dot_dimension_numbers<[1], [0], [0], [1], [0, 0, 1, 1], [], []>} : vector<2x128xf32>, vector<128x128xf32>, vector<2x128xf32> -> vector<2x128xf32>
    %106 = arith.addf %104, %105 : vector<2x128xf32>
    %107 = math.tanh %106 : vector<2x128xf32>
    %c2_44 = arith.constant 2 : index
    %c0_45 = arith.constant 0 : index
    %c0_46 = arith.constant 0 : index
    %108 = vector.load %arg3[%c2_44, %c0_45, %c0_46] : memref<6x2x128xf32, #tpu.memory_space<vmem>>, vector<1x2x128xf32>
    %109 = vector.shape_cast %108 : vector<1x2x128xf32> to vector<2x128xf32>
    %cst_47 = arith.constant dense<0.000000e+00> : vector<2x128xf32>
    %110 = tpu.matmul %107, %3, %cst_47 {dimension_numbers = #tpu.dot_dimension_numbers<[1], [0], [0], [1], [0, 0, 1, 1], [], []>} : vector<2x128xf32>, vector<128x128xf32>, vector<2x128xf32> -> vector<2x128xf32>
    %111 = arith.addf %109, %110 : vector<2x128xf32>
    %112 = math.tanh %111 : vector<2x128xf32>
    %c3_48 = arith.constant 3 : index
    %c0_49 = arith.constant 0 : index
    %c0_50 = arith.constant 0 : index
    %113 = vector.load %arg3[%c3_48, %c0_49, %c0_50] : memref<6x2x128xf32, #tpu.memory_space<vmem>>, vector<1x2x128xf32>
    %114 = vector.shape_cast %113 : vector<1x2x128xf32> to vector<2x128xf32>
    %cst_51 = arith.constant dense<0.000000e+00> : vector<2x128xf32>
    %115 = tpu.matmul %112, %3, %cst_51 {dimension_numbers = #tpu.dot_dimension_numbers<[1], [0], [0], [1], [0, 0, 1, 1], [], []>} : vector<2x128xf32>, vector<128x128xf32>, vector<2x128xf32> -> vector<2x128xf32>
    %116 = arith.addf %114, %115 : vector<2x128xf32>
    %117 = math.tanh %116 : vector<2x128xf32>
    %c4_52 = arith.constant 4 : index
    %c0_53 = arith.constant 0 : index
    %c0_54 = arith.constant 0 : index
    %118 = vector.load %arg3[%c4_52, %c0_53, %c0_54] : memref<6x2x128xf32, #tpu.memory_space<vmem>>, vector<1x2x128xf32>
    %119 = vector.shape_cast %118 : vector<1x2x128xf32> to vector<2x128xf32>
    %cst_55 = arith.constant dense<0.000000e+00> : vector<2x128xf32>
    %120 = tpu.matmul %117, %3, %cst_55 {dimension_numbers = #tpu.dot_dimension_numbers<[1], [0], [0], [1], [0, 0, 1, 1], [], []>} : vector<2x128xf32>, vector<128x128xf32>, vector<2x128xf32> -> vector<2x128xf32>
    %121 = arith.addf %119, %120 : vector<2x128xf32>
    %122 = math.tanh %121 : vector<2x128xf32>
    %c5_56 = arith.constant 5 : index
    %c0_57 = arith.constant 0 : index
    %c0_58 = arith.constant 0 : index
    %123 = vector.load %arg3[%c5_56, %c0_57, %c0_58] : memref<6x2x128xf32, #tpu.memory_space<vmem>>, vector<1x2x128xf32>
    %124 = vector.shape_cast %123 : vector<1x2x128xf32> to vector<2x128xf32>
    %cst_59 = arith.constant dense<0.000000e+00> : vector<2x128xf32>
    %125 = tpu.matmul %122, %3, %cst_59 {dimension_numbers = #tpu.dot_dimension_numbers<[1], [0], [0], [1], [0, 0, 1, 1], [], []>} : vector<2x128xf32>, vector<128x128xf32>, vector<2x128xf32> -> vector<2x128xf32>
    %126 = arith.addf %124, %125 : vector<2x128xf32>
    %127 = math.tanh %126 : vector<2x128xf32>
    %128 = vector.extract_strided_slice %102 {offsets = [0, 0], sizes = [1, 128], strides = [1, 1]} : vector<2x128xf32> to vector<1x128xf32>
    %129 = vector.extract_strided_slice %107 {offsets = [0, 0], sizes = [1, 128], strides = [1, 1]} : vector<2x128xf32> to vector<1x128xf32>
    %130 = vector.extract_strided_slice %112 {offsets = [0, 0], sizes = [1, 128], strides = [1, 1]} : vector<2x128xf32> to vector<1x128xf32>
    %131 = vector.extract_strided_slice %117 {offsets = [0, 0], sizes = [1, 128], strides = [1, 1]} : vector<2x128xf32> to vector<1x128xf32>
    %132 = vector.extract_strided_slice %122 {offsets = [0, 0], sizes = [1, 128], strides = [1, 1]} : vector<2x128xf32> to vector<1x128xf32>
    %133 = vector.extract_strided_slice %127 {offsets = [0, 0], sizes = [1, 128], strides = [1, 1]} : vector<2x128xf32> to vector<1x128xf32>
    %134 = vector.extract_strided_slice %102 {offsets = [1, 0], sizes = [1, 128], strides = [1, 1]} : vector<2x128xf32> to vector<1x128xf32>
    %135 = vector.extract_strided_slice %107 {offsets = [1, 0], sizes = [1, 128], strides = [1, 1]} : vector<2x128xf32> to vector<1x128xf32>
    %136 = vector.extract_strided_slice %112 {offsets = [1, 0], sizes = [1, 128], strides = [1, 1]} : vector<2x128xf32> to vector<1x128xf32>
    %137 = vector.extract_strided_slice %117 {offsets = [1, 0], sizes = [1, 128], strides = [1, 1]} : vector<2x128xf32> to vector<1x128xf32>
    %138 = vector.extract_strided_slice %122 {offsets = [1, 0], sizes = [1, 128], strides = [1, 1]} : vector<2x128xf32> to vector<1x128xf32>
    %139 = vector.extract_strided_slice %127 {offsets = [1, 0], sizes = [1, 128], strides = [1, 1]} : vector<2x128xf32> to vector<1x128xf32>
    %140 = tpu.concatenate %128, %129, %130, %131, %132, %133, %134, %135, %136, %137, %138, %139 in 0 : vector<1x128xf32>, vector<1x128xf32>, vector<1x128xf32>, vector<1x128xf32>, vector<1x128xf32>, vector<1x128xf32>, vector<1x128xf32>, vector<1x128xf32>, vector<1x128xf32>, vector<1x128xf32>, vector<1x128xf32>, vector<1x128xf32> -> vector<12x128xf32>
    %c0_60 = arith.constant 0 : index
    %c0_61 = arith.constant 0 : index
    %141 = vector.load %arg6[%c0_60, %c0_61] : memref<128x128xf32, #tpu.memory_space<vmem>>, vector<128x128xf32>
    %cst_62 = arith.constant dense<0.000000e+00> : vector<12x128xf32>
    %142 = tpu.matmul %140, %141, %cst_62 {dimension_numbers = #tpu.dot_dimension_numbers<[1], [0], [0], [1], [0, 0, 1, 1], [], []>} : vector<12x128xf32>, vector<128x128xf32>, vector<12x128xf32> -> vector<12x128xf32>
    %143 = tpu.iota {dimensions = array<i32: 1>} : vector<6x128xi32>
    %c0_63 = arith.constant 0 : index
    %c0_64 = arith.constant 0 : index
    %144 = vector.load %arg12[%c0_63, %c0_64] : memref<256x128xf32, #tpu.memory_space<vmem>>, vector<128x128xf32>
    %145 = vector.extract_strided_slice %142 {offsets = [0, 0], sizes = [6, 128], strides = [1, 1]} : vector<12x128xf32> to vector<6x128xf32>
    %cst_65 = arith.constant dense<0.000000e+00> : vector<6x128xf32>
    %146 = tpu.matmul %145, %144, %cst_65 {dimension_numbers = #tpu.dot_dimension_numbers<[1], [1], [0], [0], [0, 0, 1, 0], [], []>} : vector<6x128xf32>, vector<128x128xf32>, vector<6x128xf32> -> vector<6x128xf32>
    %c0_66 = arith.constant 0 : index
    %147 = memref.load %arg1[%c0_66] : memref<2xi32, #tpu.memory_space<smem>>
    %148 = vector.broadcast %147 : i32 to vector<6x128xi32>
    %149 = arith.cmpi slt, %143, %148 : vector<6x128xi32>
    %cst_67 = arith.constant -1.000000e+30 : f32
    %150 = vector.broadcast %cst_67 : f32 to vector<6x128xf32>
    %151 = arith.select %149, %146, %150 : vector<6x128xi1>, vector<6x128xf32>
    %cst_68 = arith.constant dense<0xFF800000> : vector<6xf32>
    %152 = vector.multi_reduction <maximumf>, %151, %cst_68 [1] : vector<6x128xf32> to vector<6xf32>
    %153 = vector.shape_cast %152 : vector<6xf32> to vector<6x1xf32>
    %154 = vector.broadcast %153 : vector<6x1xf32> to vector<6x128xf32>
    %155 = arith.subf %151, %154 : vector<6x128xf32>
    %156 = math.exp %155 : vector<6x128xf32>
    %cst_69 = arith.constant dense<0.000000e+00> : vector<6xf32>
    %157 = vector.multi_reduction <add>, %156, %cst_69 [1] : vector<6x128xf32> to vector<6xf32>
    %158 = vector.shape_cast %157 : vector<6xf32> to vector<6x1xf32>
    %159 = tpu.reciprocal %158 {approx = true} : vector<6x1xf32> -> vector<6x1xf32>
    %160 = vector.broadcast %159 : vector<6x1xf32> to vector<6x128xf32>
    %161 = arith.mulf %156, %160 : vector<6x128xf32>
    %cst_70 = arith.constant dense<0.000000e+00> : vector<6x128xf32>
    %162 = tpu.matmul %161, %144, %cst_70 {dimension_numbers = #tpu.dot_dimension_numbers<[1], [0], [0], [1], [0, 0, 1, 1], [], []>} : vector<6x128xf32>, vector<128x128xf32>, vector<6x128xf32> -> vector<6x128xf32>
    %c0_71 = arith.constant 0 : index
    %c0_72 = arith.constant 0 : index
    %163 = vector.load %arg11[%c0_71, %c0_72] : memref<12x128xf32, #tpu.memory_space<vmem>>, vector<6x128xf32>
    tpu.vector_store %arg11[%c0_71, %c0_72], %161 {strides = array<i32>} : memref<12x128xf32, #tpu.memory_space<vmem>>, vector<6x128xf32>,
    %c128_73 = arith.constant 128 : index
    %c0_74 = arith.constant 0 : index
    %164 = vector.load %arg12[%c128_73, %c0_74] : memref<256x128xf32, #tpu.memory_space<vmem>>, vector<128x128xf32>
    %165 = vector.extract_strided_slice %142 {offsets = [6, 0], sizes = [6, 128], strides = [1, 1]} : vector<12x128xf32> to vector<6x128xf32>
    %cst_75 = arith.constant dense<0.000000e+00> : vector<6x128xf32>
    %166 = tpu.matmul %165, %164, %cst_75 {dimension_numbers = #tpu.dot_dimension_numbers<[1], [1], [0], [0], [0, 0, 1, 0], [], []>} : vector<6x128xf32>, vector<128x128xf32>, vector<6x128xf32> -> vector<6x128xf32>
    %c1_76 = arith.constant 1 : index
    %167 = memref.load %arg1[%c1_76] : memref<2xi32, #tpu.memory_space<smem>>
    %168 = vector.broadcast %167 : i32 to vector<6x128xi32>
    %169 = arith.cmpi slt, %143, %168 : vector<6x128xi32>
    %cst_77 = arith.constant -1.000000e+30 : f32
    %170 = vector.broadcast %cst_77 : f32 to vector<6x128xf32>
    %171 = arith.select %169, %166, %170 : vector<6x128xi1>, vector<6x128xf32>
    %cst_78 = arith.constant dense<0xFF800000> : vector<6xf32>
    %172 = vector.multi_reduction <maximumf>, %171, %cst_78 [1] : vector<6x128xf32> to vector<6xf32>
    %173 = vector.shape_cast %172 : vector<6xf32> to vector<6x1xf32>
    %174 = vector.broadcast %173 : vector<6x1xf32> to vector<6x128xf32>
    %175 = arith.subf %171, %174 : vector<6x128xf32>
    %176 = math.exp %175 : vector<6x128xf32>
    %cst_79 = arith.constant dense<0.000000e+00> : vector<6xf32>
    %177 = vector.multi_reduction <add>, %176, %cst_79 [1] : vector<6x128xf32> to vector<6xf32>
    %178 = vector.shape_cast %177 : vector<6xf32> to vector<6x1xf32>
    %179 = tpu.reciprocal %178 {approx = true} : vector<6x1xf32> -> vector<6x1xf32>
    %180 = vector.broadcast %179 : vector<6x1xf32> to vector<6x128xf32>
    %181 = arith.mulf %176, %180 : vector<6x128xf32>
    %cst_80 = arith.constant dense<0.000000e+00> : vector<6x128xf32>
    %182 = tpu.matmul %181, %164, %cst_80 {dimension_numbers = #tpu.dot_dimension_numbers<[1], [0], [0], [1], [0, 0, 1, 1], [], []>} : vector<6x128xf32>, vector<128x128xf32>, vector<6x128xf32> -> vector<6x128xf32>
    %c6_81 = arith.constant 6 : index
    %c0_82 = arith.constant 0 : index
    %183 = vector.load %arg11[%c6_81, %c0_82] : memref<12x128xf32, #tpu.memory_space<vmem>>, vector<6x128xf32>
    tpu.vector_store %arg11[%c6_81, %c0_82], %181 {strides = array<i32>} : memref<12x128xf32, #tpu.memory_space<vmem>>, vector<6x128xf32>,
    %184 = tpu.concatenate %162, %182 in 0 : vector<6x128xf32>, vector<6x128xf32> -> vector<12x128xf32>
    %c0_83 = arith.constant 0 : index
    %c0_84 = arith.constant 0 : index
    %185 = vector.load %arg7[%c0_83, %c0_84] : memref<128x128xf32, #tpu.memory_space<vmem>>, vector<128x128xf32>
    %cst_85 = arith.constant dense<0.000000e+00> : vector<12x128xf32>
    %186 = tpu.matmul %184, %185, %cst_85 {dimension_numbers = #tpu.dot_dimension_numbers<[1], [0], [0], [1], [0, 0, 1, 1], [], []>} : vector<12x128xf32>, vector<128x128xf32>, vector<12x128xf32> -> vector<12x128xf32>
    %c0_86 = arith.constant 0 : index
    %c0_87 = arith.constant 0 : index
    %187 = vector.load %arg8[%c0_86, %c0_87] : memref<128x128xf32, #tpu.memory_space<vmem>>, vector<128x128xf32>
    %cst_88 = arith.constant dense<0.000000e+00> : vector<12x128xf32>
    %188 = tpu.matmul %140, %187, %cst_88 {dimension_numbers = #tpu.dot_dimension_numbers<[1], [0], [0], [1], [0, 0, 1, 1], [], []>} : vector<12x128xf32>, vector<128x128xf32>, vector<12x128xf32> -> vector<12x128xf32>
    %189 = arith.addf %186, %188 : vector<12x128xf32>
    %c0_89 = arith.constant 0 : index
    %c0_90 = arith.constant 0 : index
    %190 = vector.load %arg9[%c0_89, %c0_90] : memref<1x128xf32, #tpu.memory_space<vmem>>, vector<1x128xf32>
    %191 = vector.broadcast %190 : vector<1x128xf32> to vector<12x128xf32>
    %192 = arith.addf %189, %191 : vector<12x128xf32>
    %193 = math.tanh %192 : vector<12x128xf32>
    %c0_91 = arith.constant 0 : index
    %c0_92 = arith.constant 0 : index
    %194 = vector.load %arg10[%c0_91, %c0_92] : memref<12x128xf32, #tpu.memory_space<vmem>>, vector<12x128xf32>
    tpu.vector_store %arg10[%c0_91, %c0_92], %193 {strides = array<i32>} : memref<12x128xf32, #tpu.memory_space<vmem>>, vector<12x128xf32>,
    return
  }
  func.func @transform_0(%arg0: i32) -> i32 {
    %c0_i32 = arith.constant 0 : i32
    %c0_i32_0 = arith.constant 0 : i32
    return %c0_i32 : i32
  }
  func.func @transform_1(%arg0: i32) -> (i32, i32, i32) {
    %c0_i32 = arith.constant 0 : i32
    %c0_i32_0 = arith.constant 0 : i32
    %c0_i32_1 = arith.constant 0 : i32
    %c0_i32_2 = arith.constant 0 : i32
    return %c0_i32, %c0_i32_0, %c0_i32_1 : i32, i32, i32
  }
  func.func @transform_2(%arg0: i32) -> (i32, i32, i32) {
    %c0_i32 = arith.constant 0 : i32
    %c0_i32_0 = arith.constant 0 : i32
    %c0_i32_1 = arith.constant 0 : i32
    %c0_i32_2 = arith.constant 0 : i32
    return %c0_i32, %c0_i32_0, %c0_i32_1 : i32, i32, i32
  }
  func.func @transform_3(%arg0: i32) -> (i32, i32) {
    %c0_i32 = arith.constant 0 : i32
    %c0_i32_0 = arith.constant 0 : i32
    %c0_i32_1 = arith.constant 0 : i32
    return %c0_i32, %c0_i32_0 : i32, i32
  }
  func.func @transform_4(%arg0: i32) -> (i32, i32) {
    %c0_i32 = arith.constant 0 : i32
    %c0_i32_0 = arith.constant 0 : i32
    %c0_i32_1 = arith.constant 0 : i32
    return %c0_i32, %c0_i32_0 : i32, i32
  }
  func.func @transform_5(%arg0: i32) -> (i32, i32) {
    %c0_i32 = arith.constant 0 : i32
    %c0_i32_0 = arith.constant 0 : i32
    %c0_i32_1 = arith.constant 0 : i32
    return %c0_i32, %c0_i32_0 : i32, i32
  }
  func.func @transform_6(%arg0: i32) -> (i32, i32) {
    %c0_i32 = arith.constant 0 : i32
    %c0_i32_0 = arith.constant 0 : i32
    %c0_i32_1 = arith.constant 0 : i32
    return %c0_i32, %c0_i32_0 : i32, i32
  }
  func.func @transform_7(%arg0: i32) -> (i32, i32) {
    %c0_i32 = arith.constant 0 : i32
    %c0_i32_0 = arith.constant 0 : i32
    %c0_i32_1 = arith.constant 0 : i32
    return %c0_i32, %c0_i32_0 : i32, i32
  }
  func.func @transform_8(%arg0: i32) -> (i32, i32) {
    %c0_i32 = arith.constant 0 : i32
    %c0_i32_0 = arith.constant 0 : i32
    %c0_i32_1 = arith.constant 0 : i32
    return %c0_i32, %c0_i32_0 : i32, i32
  }
  func.func @transform_9(%arg0: i32) -> (i32, i32) {
    %c0_i32 = arith.constant 0 : i32
    %c0_i32_0 = arith.constant 0 : i32
    %c0_i32_1 = arith.constant 0 : i32
    return %c0_i32, %c0_i32_0 : i32, i32
  }
  func.func @transform_10(%arg0: i32) -> (i32, i32) {
    %c0_i32 = arith.constant 0 : i32
    %c0_i32_0 = arith.constant 0 : i32
    %c0_i32_1 = arith.constant 0 : i32
    return %c0_i32, %c0_i32_0 : i32, i32
  }
}

</mosaic_0001>

<bundles_post_ra>
// kernel: nmt_forward.1
= control target key start
LH: loop header
LB: loop body
LE: loop exit
PB: predicated region body
PF: predicated region fallthrough
CT: control target
= control target key end

     0   :  { %16 = vsyncpa [#allocation4], 0  ;;  %s4427_s0 = inlined_call_operand.vmem [shape: s32[2], index: 0, kind: input, shape index: {}]   ;;  %s4428_s1 = inlined_call_operand.vmem [shape: f32[8,4,128], index: 1, kind: input, shape index: {}]   ;;  %s4429_s2 = inlined_call_operand.vmem [shape: f32[6,2,128], index: 2, kind: input, shape index: {}]   ;;  %s4430_s3 = inlined_call_operand.vmem [shape: f32[128,128], index: 3, kind: input, shape index: {}]   ;;  %s4431_s4 = inlined_call_operand.vmem [shape: f32[128,128], index: 4, kind: input, shape index: {}]   ;;  %s4432_s5 = inlined_call_operand.vmem [shape: f32[128,128], index: 5, kind: input, shape index: {}]   ;;  %s4433_s6 = inlined_call_operand.vmem [shape: f32[128,128], index: 6, kind: input, shape index: {}]   ;;  %s4434_s7 = inlined_call_operand.vmem [shape: f32[128,128], index: 7, kind: input, shape index: {}]   ;;  %s4435_s8 = inlined_call_operand.vmem [shape: f32[1,128], index: 8, kind: input, shape index: {}]   ;;  %s4436_s9 = inlined_call_operand.vmem [shape: f32[12,128], index: 9, kind: output, shape index: {0}]   ;;  %s4437_s10 = inlined_call_operand.vmem [shape: f32[12,128], index: 10, kind: output, shape index: {1}]  }
   0x1   :  { %s23_s15 = sshll.u32 %s4427_s0, 4  ;;  %s24_s15 = int_to_ptr.vmem [resolvable:$true] %s23_s15 }
   0x2   :  { %s3610_s16 = scalar_lea.vmem %s24_s15, 16  ;;  %p3615_p1 = scmp.lt.s32.totalorder %s24_s15, %s24_s15 }
   0x3   :  { %p3611_p0 = scmp.ne.s32.totalorder %s24_s15, %s3610_s16  ;;  %p3616_p2 = scmp.lt.s32.totalorder %s3610_s16, %s3610_s16 }
   0x5   :  { %p3617_p3 = por %p3616_p2, %p3615_p1 }
   0x7   :  { %p3618_p4 = pnand %p3617_p3, %p3611_p0 }
   0x9   :  { %3621 = shalt.err (!%p3618_p4)
}
   0xa   :  { %s3624_s17 = smov [#allocation3]  }
   0xb   :  { %26 = dma.vmem_to_smem %s24_s15, 16, %s3624_s17, [#allocation4]  }
   0xc   :  { %3622 = dma.done.wait [#allocation4], 16  }
   0xd   :  { %3623 = vsyncadd [#allocation4], 4294967280 }
   0xe   :  { %46 = sfence }
   0xf   :  { %v79_v0 = vld [vmem:[%s4430_s3] sm:$0xff]  ;;  %v80_v1 = vld [vmem:[%s4430_s3 + $0x8] sm:$0xff]  ;;  %v81_v2 = vld [vmem:[%s4430_s3 + $0x10] sm:$0xff]  ;;  %v3625_v3 = vmov 0.0|0.0   ;;  %vm3626_vm0 = vmmov 0   ;;  %v3627_v6 = vmov 0.0  }
  0x10   :  { %3035 = vmatprep.subr.bf16.mxu0 %v3625_v3  ;;  %v3696_v4 = vpack.c.bf16 %v80_v1, %v79_v0  ;;  %v82_v5 = vld [vmem:[%s4430_s3 + $0x18] sm:$0xff]  ;;  %2332 = vmatprep.mubr.msk.f32.mxu0 %vm3626_vm0, %v3627_v6  ;;  %48 = vst [vmem:[#allocation2 + $0x8] sm:$0xff] %v3627_v6  ;;  %49 = vst [vmem:[#allocation2 + $0x10] sm:$0xff] %v3627_v6  ;;  %v83_v8 = vld [vmem:[%s4430_s3 + $0x20] sm:$0xff]  ;;  %vm725_vm1 = vcmask 1041408   ;;  %vm723_vm2 = vcmask 1040384  }
  0x11   :  { %64 = vst [vmem:[#allocation2 + $0x88] sm:$0xff] %v3627_v6  ;;  %3059 = vmatprep.subr.bf16.mxu1 %v3625_v3  ;;  %2367 = vmatprep.mubr.msk.f32.mxu1 %vm3626_vm0, %v3627_v6  ;;  %v3710_v7 = vpack.c.bf16 %v82_v5, %v81_v2  ;;  %v84_v9 = vld [vmem:[%s4430_s3 + $0x28] sm:$0xff]  ;;  %v85_v11 = vld [vmem:[%s4430_s3 + $0x30] sm:$0xff]  ;;  %v86_v12 = vld [vmem:[%s4430_s3 + $0x38] sm:$0xff]  ;;  %vm727_vm3 = vcmask 1042432   ;;  %vm729_vm4 = vcmask 1043456  }
  0x12   :  { %3037 = vmatpush3.bf16.msra.mxu0 %v3696_v4  ;;  %3061 = vmatpush3.bf16.msra.mxu1 %v3696_v4  ;;  %v3722_v10 = vpack.c.bf16 %v84_v9, %v83_v8  ;;  %v3734_v13 = vpack.c.bf16 %v86_v12, %v85_v11  ;;  %v87_v14 = vld [vmem:[%s4430_s3 + $0x40] sm:$0xff]  ;;  %v88_v15 = vld [vmem:[%s4430_s3 + $0x48] sm:$0xff]  ;;  %v89_v17 = vld [vmem:[%s4430_s3 + $0x50] sm:$0xff]  ;;  %vm731_vm5 = vcmask 1044480   ;;  %vm733_vm6 = vcmask 1045504   ;;  %s1938_s28 = sld [smem:[#allocation3 + $0x1]] }
  0x13   :  { %3038 = vmatprep.subr.bf16.mxu0 %v3625_v3  ;;  %3062 = vmatprep.subr.bf16.mxu1 %v3625_v3  ;;  %v3746_v16 = vpack.c.bf16 %v88_v15, %v87_v14  ;;  %v90_v18 = vld [vmem:[%s4430_s3 + $0x58] sm:$0xff]  ;;  %v91_v20 = vld [vmem:[%s4430_s3 + $0x60] sm:$0xff]  ;;  %v92_v21 = vld [vmem:[%s4430_s3 + $0x68] sm:$0xff]  ;;  %vm735_vm7 = vcmask 1046528  }
  0x14   :  { %v3758_v19 = vpack.c.bf16 %v90_v18, %v89_v17  ;;  %v3770_v22 = vpack.c.bf16 %v92_v21, %v91_v20  ;;  %v93_v23 = vld [vmem:[%s4430_s3 + $0x70] sm:$0xff]  ;;  %v94_v24 = vld [vmem:[%s4430_s3 + $0x78] sm:$0xff]  ;;  %v111_v26 = vld [vmem:[%s4428_s1] sm:$0xf] }
  0x15   :  { %v3782_v25 = vpack.c.bf16 %v94_v24, %v93_v23  ;;  %v1926_v31 = vld [vmem:[%s4428_s1 + $0x4] sm:$0xf]  ;;  %v1927_v36 = vld [vmem:[%s4428_s1 + $0x8] sm:$0xf]  ;;  %v1928_v58 = vld [vmem:[%s4428_s1 + $0xc] sm:$0xf] }
  0x16   :  { %3040 = vmatpush3.bf16.msra.mxu0 %v3710_v7  ;;  %3064 = vmatpush3.bf16.msra.mxu1 %v3710_v7  ;;  %v1929_v11 = vld [vmem:[%s4428_s1 + $0x10] sm:$0xf] }
  0x17   :  { %3041 = vmatprep.subr.bf16.mxu0 %v3625_v3  ;;  %3065 = vmatprep.subr.bf16.mxu1 %v3625_v3 }
  0x1a   :  { %3043 = vmatpush3.bf16.msra.mxu0 %v3722_v10  ;;  %3067 = vmatpush3.bf16.msra.mxu1 %v3722_v10 }
  0x1b   :  { %3044 = vmatprep.subr.bf16.mxu0 %v3625_v3  ;;  %3068 = vmatprep.subr.bf16.mxu1 %v3625_v3 }
  0x1e   :  { %3046 = vmatpush3.bf16.msra.mxu0 %v3734_v13  ;;  %3070 = vmatpush3.bf16.msra.mxu1 %v3734_v13 }
  0x1f   :  { %3047 = vmatprep.subr.bf16.mxu0 %v3625_v3  ;;  %3071 = vmatprep.subr.bf16.mxu1 %v3625_v3 }
  0x22   :  { %3049 = vmatpush3.bf16.msra.mxu0 %v3746_v16  ;;  %3073 = vmatpush3.bf16.msra.mxu1 %v3746_v16 }
  0x23   :  { %3050 = vmatprep.subr.bf16.mxu0 %v3625_v3  ;;  %3074 = vmatprep.subr.bf16.mxu1 %v3625_v3 }
  0x26   :  { %3052 = vmatpush3.bf16.msra.mxu0 %v3758_v19  ;;  %3076 = vmatpush3.bf16.msra.mxu1 %v3758_v19 }
  0x27   :  { %3053 = vmatprep.subr.bf16.mxu0 %v3625_v3  ;;  %3077 = vmatprep.subr.bf16.mxu1 %v3625_v3 }
  0x2a   :  { %3055 = vmatpush3.bf16.msra.mxu0 %v3770_v22  ;;  %3079 = vmatpush3.bf16.msra.mxu1 %v3770_v22 }
  0x2b   :  { %3056 = vmatprep.subr.bf16.mxu0 %v3625_v3  ;;  %3080 = vmatprep.subr.bf16.mxu1 %v3625_v3 }
  0x2e   :  { %3058 = vmatpush3.bf16.msra.mxu0 %v3782_v25  ;;  %3082 = vmatpush3.bf16.msra.mxu1 %v3782_v25 }
  0x2f   :  { %3083 = vmatprep.subr.bf16.mxu0 %v3625_v3  ;;  %3107 = vmatprep.subr.bf16.mxu1 %v3625_v3 }
  0x31   :  { %2333 = vmatmul.mubr.f32.vlgmr.msra.gmra.mrb[0].mxu0 %v3627_v6 }
  0x32   :  { %3085 = vmatpush3.bf16.msra.mxu0 %v3696_v4  ;;  %2402 = vmatprep.mubr.msk.f32.mxu0 %vm3626_vm0, %v3627_v6 }
  0x33   :  { %3086 = vmatprep.subr.bf16.mxu0 %v3625_v3 }
  0x36   :  { %3088 = vmatpush3.bf16.msra.mxu0 %v3710_v7 }
  0x37   :  { %3089 = vmatprep.subr.bf16.mxu0 %v3625_v3 }
  0x3a   :  { %3091 = vmatpush3.bf16.msra.mxu0 %v3722_v10 }
  0x3b   :  { %3092 = vmatprep.subr.bf16.mxu0 %v3625_v3 }
  0x3e   :  { %3094 = vmatpush3.bf16.msra.mxu0 %v3734_v13 }
  0x3f   :  { %3095 = vmatprep.subr.bf16.mxu0 %v3625_v3 }
  0x42   :  { %3097 = vmatpush3.bf16.msra.mxu0 %v3746_v16 }
  0x43   :  { %3098 = vmatprep.subr.bf16.mxu0 %v3625_v3 }
  0x46   :  { %3100 = vmatpush3.bf16.msra.mxu0 %v3758_v19 }
  0x47   :  { %3101 = vmatprep.subr.bf16.mxu0 %v3625_v3 }
  0x4a   :  { %3103 = vmatpush3.bf16.msra.mxu0 %v3770_v22 }
  0x4b   :  { %3104 = vmatprep.subr.bf16.mxu0 %v3625_v3 }
  0x4e   :  { %3106 = vmatpush3.bf16.msra.mxu0 %v3782_v25 }
  0x4f   :  { %3131 = vmatprep.subr.bf16.mxu0 %v3625_v3 }
 0x104   :  { %v178_v27 = vpop.f32.mrb[0].mxu0 }
 0x105   :  { %v182_v28 = vadd.f32 %v178_v27, %v111_v26  ;;  %v2334_v29 = vpop.f32.mrb[1].mxu0 }
 0x107   :  { %3569 = vtanh.f32 %v182_v28 }
 0x111   :  { %v3813_v30 = vpop.eup %3569 }
 0x112   :  { %2368 = vmatmul.mubr.f32.vlgmr.msra.gmra.mrb[0].mxu1 %v3813_v30  ;;  %v739_v42 = vrot.slane %v3813_v30, 2  ;;  %v755_v45 = vrot.slane %v3813_v30, 1  ;;  %v777_v47 = vrot.slane %v3813_v30, 3 }
 0x113   :  { %3109 = vmatpush3.bf16.msra.mxu1 %v3696_v4  ;;  %2437 = vmatprep.mubr.msk.f32.mxu1 %vm3626_vm0, %v3627_v6 }
 0x114   :  { %3110 = vmatprep.subr.bf16.mxu1 %v3625_v3 }
 0x117   :  { %3112 = vmatpush3.bf16.msra.mxu1 %v3710_v7 }
 0x118   :  { %3113 = vmatprep.subr.bf16.mxu1 %v3625_v3 }
 0x11b   :  { %3115 = vmatpush3.bf16.msra.mxu1 %v3722_v10 }
 0x11c   :  { %3116 = vmatprep.subr.bf16.mxu1 %v3625_v3 }
 0x11f   :  { %3118 = vmatpush3.bf16.msra.mxu1 %v3734_v13 }
 0x120   :  { %3119 = vmatprep.subr.bf16.mxu1 %v3625_v3 }
 0x123   :  { %3121 = vmatpush3.bf16.msra.mxu1 %v3746_v16 }
 0x124   :  { %3122 = vmatprep.subr.bf16.mxu1 %v3625_v3 }
 0x127   :  { %3124 = vmatpush3.bf16.msra.mxu1 %v3758_v19 }
 0x128   :  { %3125 = vmatprep.subr.bf16.mxu1 %v3625_v3 }
 0x12b   :  { %3127 = vmatpush3.bf16.msra.mxu1 %v3770_v22 }
 0x12c   :  { %3128 = vmatprep.subr.bf16.mxu1 %v3625_v3 }
 0x12f   :  { %3130 = vmatpush3.bf16.msra.mxu1 %v3782_v25 }
 0x130   :  { %3155 = vmatprep.subr.bf16.mxu1 %v3625_v3 }
 0x1e5   :  { %v252_v32 = vpop.f32.mrb[0].mxu1 }
 0x1e6   :  { %v256_v33 = vadd.f32 %v1926_v31, %v252_v32  ;;  %v2369_v34 = vpop.f32.mrb[1].mxu1 }
 0x1e7   :  { %v95_v34 = vld [vmem:[%s4431_s4] sm:$0xff] }
 0x1e8   :  { %3571 = vtanh.f32 %v256_v33 }
 0x1f2   :  { %v3572_v35 = vpop.eup %3571 }
 0x1f3   :  { %2403 = vmatmul.mubr.f32.vlgmr.msra.gmra.mrb[2].mxu0 %v3572_v35  ;;  %v741_v40 = vrot.slane %v3572_v35, 1  ;;  %v703_v41 = vrot.slane %v3572_v35, 7  ;;  %v779_v43 = vrot.slane %v3572_v35, 2  ;;  %v769_v53 = vsel %vm723_vm2, %v755_v45, %v3572_v35  ;;  %v96_v35 = vld [vmem:[%s4431_s4 + $0x8] sm:$0xff] }
 0x1f4   :  { %3133 = vmatpush3.bf16.msra.mxu0 %v3696_v4  ;;  %2472 = vmatprep.mubr.msk.f32.mxu0 %vm3626_vm0, %v3627_v6 }
 0x1f5   :  { %3134 = vmatprep.subr.bf16.mxu0 %v3625_v3  ;;  %v749_v46 = vsel %vm723_vm2, %v739_v42, %v741_v40  ;;  %v724_v52 = vsel %vm723_vm2, %v3813_v30, %v703_v41  ;;  %v787_v54 = vsel %vm723_vm2, %v777_v47, %v779_v43  ;;  %v99_v40 = vld [vmem:[%s4431_s4 + $0x20] sm:$0xff]  ;;  %v100_v41 = vld [vmem:[%s4431_s4 + $0x28] sm:$0xff]  ;;  %v101_v43 = vld [vmem:[%s4431_s4 + $0x30] sm:$0xff] }
 0x1f6   :  { %v3979_v42 = vpack.c.bf16 %v100_v41, %v99_v40 }
 0x1f8   :  { %3136 = vmatpush3.bf16.msra.mxu0 %v3710_v7 }
 0x1f9   :  { %3137 = vmatprep.subr.bf16.mxu0 %v3625_v3 }
 0x1fc   :  { %3139 = vmatpush3.bf16.msra.mxu0 %v3722_v10 }
 0x1fd   :  { %3140 = vmatprep.subr.bf16.mxu0 %v3625_v3 }
 0x200   :  { %3142 = vmatpush3.bf16.msra.mxu0 %v3734_v13 }
 0x201   :  { %3143 = vmatprep.subr.bf16.mxu0 %v3625_v3 }
 0x204   :  { %3145 = vmatpush3.bf16.msra.mxu0 %v3746_v16 }
 0x205   :  { %3146 = vmatprep.subr.bf16.mxu0 %v3625_v3 }
 0x208   :  { %3148 = vmatpush3.bf16.msra.mxu0 %v3758_v19 }
 0x209   :  { %3149 = vmatprep.subr.bf16.mxu0 %v3625_v3 }
 0x20c   :  { %3151 = vmatpush3.bf16.msra.mxu0 %v3770_v22 }
 0x20d   :  { %3152 = vmatprep.subr.bf16.mxu0 %v3625_v3 }
 0x210   :  { %3154 = vmatpush3.bf16.msra.mxu0 %v3782_v25 }
 0x211   :  { %3179 = vmatprep.subr.bf16.mxu0 %v3625_v3 }
 0x2c6   :  { %v326_v37 = vpop.f32.mrb[2].mxu0 }
 0x2c7   :  { %v330_v38 = vadd.f32 %v1927_v36, %v326_v37  ;;  %v2404_v39 = vpop.f32.mrb[3].mxu0  ;;  %v97_v36 = vld [vmem:[%s4431_s4 + $0x10] sm:$0xff]  ;;  %v3963_v37 = vpack.c.bf16 %v96_v35, %v95_v34  ;;  %v1935_v35 = vld [vmem:[%s4429_s2 + $0x6] sm:$0x3] }
 0x2c9   :  { %3573 = vtanh.f32 %v330_v38  ;;  %v98_v38 = vld [vmem:[%s4431_s4 + $0x18] sm:$0xff] }
 0x2ca   :  { %v3969_v39 = vpack.c.bf16 %v98_v38, %v97_v36 }
 0x2d3   :  { %v3574_v44 = vpop.eup %3573 }
 0x2d4   :  { %2438 = vmatmul.mubr.f32.vlgmr.msra.gmra.mrb[2].mxu1 %v3574_v44  ;;  %v706_v48 = vrot.slane %v3574_v44, 6  ;;  %v757_v49 = vrot.slane %v3574_v44, 7  ;;  %v750_v50 = vsel %vm725_vm1, %v749_v46, %v3574_v44  ;;  %v781_v51 = vrot.slane %v3574_v44, 1  ;;  %v102_v44 = vld [vmem:[%s4431_s4 + $0x38] sm:$0xff] }
 0x2d5   :  { %3157 = vmatpush3.bf16.msra.mxu1 %v3696_v4  ;;  %2507 = vmatprep.mubr.msk.f32.mxu1 %vm3626_vm0, %v3627_v6  ;;  %v3989_v45 = vpack.c.bf16 %v102_v44, %v101_v43  ;;  %v1931_v46 = vld [vmem:[%s4428_s1 + $0x18] sm:$0xf]  ;;  %v1275_v44 = vld [vmem:[%s4432_s5] sm:$0xff] }
 0x2d6   :  { %3158 = vmatprep.subr.bf16.mxu1 %v3625_v3  ;;  %v726_v55 = vsel %vm725_vm1, %v724_v52, %v706_v48  ;;  %v770_v56 = vsel %vm725_vm1, %v769_v53, %v757_v49  ;;  %v788_v57 = vsel %vm725_vm1, %v787_v54, %v781_v51 }
 0x2d9   :  { %3160 = vmatpush3.bf16.msra.mxu1 %v3710_v7 }
 0x2da   :  { %3161 = vmatprep.subr.bf16.mxu1 %v3625_v3 }
 0x2dd   :  { %3163 = vmatpush3.bf16.msra.mxu1 %v3722_v10 }
 0x2de   :  { %3164 = vmatprep.subr.bf16.mxu1 %v3625_v3 }
 0x2e1   :  { %3166 = vmatpush3.bf16.msra.mxu1 %v3734_v13 }
 0x2e2   :  { %3167 = vmatprep.subr.bf16.mxu1 %v3625_v3 }
 0x2e5   :  { %3169 = vmatpush3.bf16.msra.mxu1 %v3746_v16 }
 0x2e6   :  { %3170 = vmatprep.subr.bf16.mxu1 %v3625_v3 }
 0x2e9   :  { %3172 = vmatpush3.bf16.msra.mxu1 %v3758_v19 }
 0x2ea   :  { %3173 = vmatprep.subr.bf16.mxu1 %v3625_v3 }
 0x2ed   :  { %3175 = vmatpush3.bf16.msra.mxu1 %v3770_v22 }
 0x2ee   :  { %3176 = vmatprep.subr.bf16.mxu1 %v3625_v3 }
 0x2f1   :  { %3178 = vmatpush3.bf16.msra.mxu1 %v3782_v25 }
 0x2f2   :  { %3203 = vmatprep.subr.bf16.mxu1 %v3625_v3 }
 0x3a7   :  { %v400_v59 = vpop.f32.mrb[2].mxu1 }
 0x3a8   :  { %v404_v60 = vadd.f32 %v1928_v58, %v400_v59  ;;  %v2439_v61 = vpop.f32.mrb[3].mxu1  ;;  %v105_v58 = vld [vmem:[%s4431_s4 + $0x50] sm:$0xff]  ;;  %v106_v59 = vld [vmem:[%s4431_s4 + $0x58] sm:$0xff] }
 0x3a9   :  { %v107_v61 = vld [vmem:[%s4431_s4 + $0x60] sm:$0xff] }
 0x3aa   :  { %3575 = vtanh.f32 %v404_v60  ;;  %v4027_v60 = vpack.c.bf16 %v106_v59, %v105_v58 }
 0x3b4   :  { %v3576_v62 = vpop.eup %3575 }
 0x3b5   :  { %2473 = vmatmul.mubr.f32.vlgmr.msra.gmra.mrb[4].mxu0 %v3576_v62  ;;  %v709_v63 = vrot.slane %v3576_v62, 5  ;;  %v759_v0 = vrot.slane %v3576_v62, 6  ;;  %v743_v1 = vrot.slane %v3576_v62, 7  ;;  %v789_v2 = vsel %vm727_vm3, %v788_v57, %v3576_v62  ;;  %v108_v62 = vld [vmem:[%s4431_s4 + $0x68] sm:$0xff] }
 0x3b6   :  { %3181 = vmatpush3.bf16.msra.mxu0 %v3696_v4  ;;  %2542 = vmatprep.mubr.msk.f32.mxu0 %vm3626_vm0, %v3627_v6 }
 0x3b7   :  { %3182 = vmatprep.subr.bf16.mxu0 %v3625_v3  ;;  %v728_v5 = vsel %vm727_vm3, %v726_v55, %v709_v63  ;;  %v771_v8 = vsel %vm727_vm3, %v770_v56, %v759_v0  ;;  %v751_v9 = vsel %vm727_vm3, %v750_v50, %v743_v1  ;;  %v103_v55 = vld [vmem:[%s4431_s4 + $0x40] sm:$0xff]  ;;  %v104_v56 = vld [vmem:[%s4431_s4 + $0x48] sm:$0xff]  ;;  %v4039_v63 = vpack.c.bf16 %v108_v62, %v107_v61  ;;  %v109_v0 = vld [vmem:[%s4431_s4 + $0x70] sm:$0xff] }
 0x3b8   :  { %v4015_v57 = vpack.c.bf16 %v104_v56, %v103_v55  ;;  %v110_v1 = vld [vmem:[%s4431_s4 + $0x78] sm:$0xff]  ;;  %v1936_v56 = vld [vmem:[%s4429_s2 + $0x8] sm:$0x3] }
 0x3ba   :  { %3184 = vmatpush3.bf16.msra.mxu0 %v3710_v7 }
 0x3bb   :  { %3185 = vmatprep.subr.bf16.mxu0 %v3625_v3 }
 0x3be   :  { %3187 = vmatpush3.bf16.msra.mxu0 %v3722_v10 }
 0x3bf   :  { %3188 = vmatprep.subr.bf16.mxu0 %v3625_v3 }
 0x3c2   :  { %3190 = vmatpush3.bf16.msra.mxu0 %v3734_v13 }
 0x3c3   :  { %3191 = vmatprep.subr.bf16.mxu0 %v3625_v3 }
 0x3c6   :  { %3193 = vmatpush3.bf16.msra.mxu0 %v3746_v16 }
 0x3c7   :  { %3194 = vmatprep.subr.bf16.mxu0 %v3625_v3 }
 0x3ca   :  { %3196 = vmatpush3.bf16.msra.mxu0 %v3758_v19 }
 0x3cb   :  { %3197 = vmatprep.subr.bf16.mxu0 %v3625_v3 }
 0x3ce   :  { %3199 = vmatpush3.bf16.msra.mxu0 %v3770_v22 }
 0x3cf   :  { %3200 = vmatprep.subr.bf16.mxu0 %v3625_v3 }
 0x3d2   :  { %3202 = vmatpush3.bf16.msra.mxu0 %v3782_v25 }
 0x3d3   :  { %3227 = vmatprep.subr.bf16.mxu0 %v3625_v3 }
 0x488   :  { %v474_v12 = vpop.f32.mrb[4].mxu0 }
 0x489   :  { %v478_v14 = vadd.f32 %v1929_v11, %v474_v12  ;;  %v2474_v15 = vpop.f32.mrb[5].mxu0 }
 0x48b   :  { %3577 = vtanh.f32 %v478_v14 }
 0x495   :  { %v3578_v17 = vpop.eup %3577 }
 0x496   :  { %2508 = vmatmul.mubr.f32.vlgmr.msra.gmra.mrb[4].mxu1 %v3578_v17  ;;  %v712_v18 = vrot.slane %v3578_v17, 4  ;;  %v761_v20 = vrot.slane %v3578_v17, 5  ;;  %v745_v21 = vrot.slane %v3578_v17, 6  ;;  %v783_v23 = vrot.slane %v3578_v17, 7 }
 0x497   :  { %3205 = vmatpush3.bf16.msra.mxu1 %v3696_v4  ;;  %2577 = vmatprep.mubr.msk.f32.mxu1 %vm3626_vm0, %v3627_v6  ;;  %v1930_v4 = vld [vmem:[%s4428_s1 + $0x14] sm:$0xf] }
 0x498   :  { %3206 = vmatprep.subr.bf16.mxu1 %v3625_v3  ;;  %v730_v24 = vsel %vm729_vm4, %v728_v5, %v712_v18  ;;  %v772_v26 = vsel %vm729_vm4, %v771_v8, %v761_v20  ;;  %v752_v27 = vsel %vm729_vm4, %v751_v9, %v745_v21  ;;  %v790_v28 = vsel %vm729_vm4, %v789_v2, %v783_v23  ;;  %v1932_v5 = vld [vmem:[%s4428_s1 + $0x1c] sm:$0xf]  ;;  %v796_v23 = vld [vmem:[%s4429_s2] sm:$0x3] }
 0x499   :  { %v4051_v2 = vpack.c.bf16 %v110_v1, %v109_v0 }
 0x49b   :  { %3208 = vmatpush3.bf16.msra.mxu1 %v3710_v7 }
 0x49c   :  { %3209 = vmatprep.subr.bf16.mxu1 %v3625_v3 }
 0x49f   :  { %3211 = vmatpush3.bf16.msra.mxu1 %v3722_v10 }
 0x4a0   :  { %3212 = vmatprep.subr.bf16.mxu1 %v3625_v3 }
 0x4a3   :  { %3214 = vmatpush3.bf16.msra.mxu1 %v3734_v13 }
 0x4a4   :  { %3215 = vmatprep.subr.bf16.mxu1 %v3625_v3 }
 0x4a7   :  { %3217 = vmatpush3.bf16.msra.mxu1 %v3746_v16 }
 0x4a8   :  { %3218 = vmatprep.subr.bf16.mxu1 %v3625_v3 }
 0x4ab   :  { %3220 = vmatpush3.bf16.msra.mxu1 %v3758_v19 }
 0x4ac   :  { %3221 = vmatprep.subr.bf16.mxu1 %v3625_v3 }
 0x4af   :  { %3223 = vmatpush3.bf16.msra.mxu1 %v3770_v22 }
 0x4b0   :  { %3224 = vmatprep.subr.bf16.mxu1 %v3625_v3 }
 0x4b3   :  { %3226 = vmatpush3.bf16.msra.mxu1 %v3782_v25 }
 0x4b4   :  { %3251 = vmatprep.subr.bf16.mxu1 %v3625_v3 }
 0x569   :  { %v548_v7 = vpop.f32.mrb[4].mxu1 }
 0x56a   :  { %v552_v10 = vadd.f32 %v1930_v4, %v548_v7  ;;  %v2509_v13 = vpop.f32.mrb[5].mxu1  ;;  %v1933_v4 = vld [vmem:[%s4429_s2 + $0x2] sm:$0x3] }
 0x56c   :  { %3579 = vtanh.f32 %v552_v10 }
 0x576   :  { %v3941_v16 = vpop.eup %3579 }
 0x577   :  { %2543 = vmatmul.mubr.f32.vlgmr.msra.gmra.mrb[6].mxu0 %v3941_v16  ;;  %v715_v19 = vrot.slane %v3941_v16, 3  ;;  %v763_v22 = vrot.slane %v3941_v16, 4  ;;  %v747_v25 = vrot.slane %v3941_v16, 5  ;;  %v785_v29 = vrot.slane %v3941_v16, 6 }
 0x578   :  { %2612 = vmatprep.mubr.msk.f32.mxu0 %vm3626_vm0, %v3627_v6  ;;  %3229 = vmatpush3.bf16.msra.mxu0 %v3963_v37  ;;  %v793_v12 = vrot.slane %v3941_v16, 2 }
 0x579   :  { %v732_v30 = vsel %vm731_vm5, %v730_v24, %v715_v19  ;;  %v773_v31 = vsel %vm731_vm5, %v772_v26, %v763_v22  ;;  %v753_v32 = vsel %vm731_vm5, %v752_v27, %v747_v25  ;;  %v791_v33 = vsel %vm731_vm5, %v790_v28, %v785_v29  ;;  %3230 = vmatprep.subr.bf16.mxu0 %v3625_v3  ;;  %v1934_v19 = vld [vmem:[%s4429_s2 + $0x4] sm:$0x3] }
 0x57a   :  { %754 = vst [vmem:[#allocation2 + $0x8] sm:$0x3f] %v753_v32  ;;  %792 = vst [vmem:[#allocation2 + $0x88] sm:$0x3f] %v791_v33 }
 0x57c   :  { %3232 = vmatpush3.bf16.msra.mxu0 %v3969_v39 }
 0x57d   :  { %3233 = vmatprep.subr.bf16.mxu0 %v3625_v3 }
 0x580   :  { %3235 = vmatpush3.bf16.msra.mxu0 %v3979_v42 }
 0x581   :  { %3236 = vmatprep.subr.bf16.mxu0 %v3625_v3 }
 0x584   :  { %3238 = vmatpush3.bf16.msra.mxu0 %v3989_v45 }
 0x585   :  { %3239 = vmatprep.subr.bf16.mxu0 %v3625_v3 }
 0x588   :  { %3241 = vmatpush3.bf16.msra.mxu0 %v4015_v57 }
 0x589   :  { %3242 = vmatprep.subr.bf16.mxu0 %v3625_v3 }
 0x58c   :  { %3244 = vmatpush3.bf16.msra.mxu0 %v4027_v60 }
 0x58d   :  { %3245 = vmatprep.subr.bf16.mxu0 %v3625_v3 }
 0x590   :  { %3247 = vmatpush3.bf16.msra.mxu0 %v4039_v63 }
 0x591   :  { %3248 = vmatprep.subr.bf16.mxu0 %v3625_v3 }
 0x594   :  { %3250 = vmatpush3.bf16.msra.mxu0 %v4051_v2 }
 0x595   :  { %3275 = vmatprep.subr.bf16.mxu0 %v3625_v3 }
 0x64a   :  { %v622_v47 = vpop.f32.mrb[6].mxu0 }
 0x64b   :  { %v626_v48 = vadd.f32 %v1931_v46, %v622_v47  ;;  %v2544_v49 = vpop.f32.mrb[7].mxu0  ;;  %v1277_v46 = vld [vmem:[%s4432_s5 + $0x10] sm:$0xff] }
 0x64d   :  { %3581 = vtanh.f32 %v626_v48  ;;  %v1278_v48 = vld [vmem:[%s4432_s5 + $0x18] sm:$0xff] }
 0x64e   :  { %v3375_v49 = vpack.c.bf16 %v1278_v48, %v1277_v46 }
 0x657   :  { %v3582_v50 = vpop.eup %3581 }
 0x658   :  { %v718_v51 = vrot.slane %v3582_v50, 2  ;;  %v765_v52 = vrot.slane %v3582_v50, 3  ;;  %2578 = vmatmul.mubr.f32.vlgmr.msra.gmra.mrb[6].mxu1 %v3582_v50  ;;  %v1279_v50 = vld [vmem:[%s4432_s5 + $0x20] sm:$0xff] }
 0x659   :  { %3253 = vmatpush3.bf16.msra.mxu1 %v3963_v37  ;;  %2647 = vmatprep.mubr.msk.f32.mxu1 %vm3626_vm0, %v3627_v6 }
 0x65a   :  { %v734_v53 = vsel %vm733_vm6, %v732_v30, %v718_v51  ;;  %v774_v54 = vsel %vm733_vm6, %v773_v31, %v765_v52  ;;  %3254 = vmatprep.subr.bf16.mxu1 %v3625_v3  ;;  %v1280_v51 = vld [vmem:[%s4432_s5 + $0x28] sm:$0xff] }
 0x65b   :  { %v3379_v52 = vpack.c.bf16 %v1280_v51, %v1279_v50 }
 0x65d   :  { %3256 = vmatpush3.bf16.msra.mxu1 %v3969_v39 }
 0x65e   :  { %3257 = vmatprep.subr.bf16.mxu1 %v3625_v3 }
 0x661   :  { %3259 = vmatpush3.bf16.msra.mxu1 %v3979_v42 }
 0x662   :  { %3260 = vmatprep.subr.bf16.mxu1 %v3625_v3 }
 0x665   :  { %3262 = vmatpush3.bf16.msra.mxu1 %v3989_v45 }
 0x666   :  { %3263 = vmatprep.subr.bf16.mxu1 %v3625_v3 }
 0x669   :  { %3265 = vmatpush3.bf16.msra.mxu1 %v4015_v57 }
 0x66a   :  { %3266 = vmatprep.subr.bf16.mxu1 %v3625_v3 }
 0x66d   :  { %3268 = vmatpush3.bf16.msra.mxu1 %v4027_v60 }
 0x66e   :  { %3269 = vmatprep.subr.bf16.mxu1 %v3625_v3 }
 0x671   :  { %3271 = vmatpush3.bf16.msra.mxu1 %v4039_v63 }
 0x672   :  { %3272 = vmatprep.subr.bf16.mxu1 %v3625_v3 }
 0x675   :  { %3274 = vmatpush3.bf16.msra.mxu1 %v4051_v2 }
 0x676   :  { %3299 = vmatprep.subr.bf16.mxu1 %v3625_v3 }
 0x72b   :  { %v696_v8 = vpop.f32.mrb[6].mxu1 }
 0x72c   :  { %v700_v9 = vadd.f32 %v1932_v5, %v696_v8  ;;  %v2579_v11 = vpop.f32.mrb[7].mxu1  ;;  %v1283_v5 = vld [vmem:[%s4432_s5 + $0x40] sm:$0xff]  ;;  %v1284_v8 = vld [vmem:[%s4432_s5 + $0x48] sm:$0xff] }
 0x72d   :  { %v1285_v11 = vld [vmem:[%s4432_s5 + $0x50] sm:$0xff] }
 0x72e   :  { %3583 = vtanh.f32 %v700_v9  ;;  %v3387_v9 = vpack.c.bf16 %v1284_v8, %v1283_v5  ;;  %v1740_v8 = vld [vmem:[%s4434_s7 + $0x10] sm:$0xff] }
 0x738   :  { %v3584_v14 = vpop.eup %3583 }
 0x739   :  { %v721_v15 = vrot.slane %v3584_v14, 1  ;;  %v767_v17 = vrot.slane %v3584_v14, 2  ;;  %v795_v18 = vadd.f32 %v3584_v14, %v793_v12  ;;  %v1287_v12 = vld [vmem:[%s4432_s5 + $0x60] sm:$0xff] }
 0x73b   :  { %v4062_v20 = vsel %vm735_vm7, %v734_v53, %v721_v15  ;;  %v4065_v21 = vsel %vm735_vm7, %v774_v54, %v767_v17  ;;  %2613 = vmatmul.mubr.f32.vlgmr.msra.gmra.mrb[8].mxu0 %v795_v18  ;;  %v1281_v53 = vld [vmem:[%s4432_s5 + $0x30] sm:$0xff]  ;;  %v1282_v54 = vld [vmem:[%s4432_s5 + $0x38] sm:$0xff]  ;;  %v1288_v15 = vld [vmem:[%s4432_s5 + $0x68] sm:$0xff] }
 0x73c   :  { %3277 = vmatpush3.bf16.msra.mxu0 %v3963_v37  ;;  %2682 = vmatprep.mubr.msk.f32.mxu0 %vm3626_vm0, %v3627_v6  ;;  %v3383_v55 = vpack.c.bf16 %v1282_v54, %v1281_v53  ;;  %v3395_v17 = vpack.c.bf16 %v1288_v15, %v1287_v12  ;;  %v1289_v18 = vld [vmem:[%s4432_s5 + $0x70] sm:$0xff]  ;;  %v1743_v15 = vld [vmem:[%s4434_s7 + $0x28] sm:$0xff] }
 0x73d   :  { %3278 = vmatprep.subr.bf16.mxu0 %v3625_v3 }
 0x740   :  { %3280 = vmatpush3.bf16.msra.mxu0 %v3969_v39 }
 0x741   :  { %3281 = vmatprep.subr.bf16.mxu0 %v3625_v3 }
 0x744   :  { %3283 = vmatpush3.bf16.msra.mxu0 %v3979_v42 }
 0x745   :  { %3284 = vmatprep.subr.bf16.mxu0 %v3625_v3 }
 0x748   :  { %3286 = vmatpush3.bf16.msra.mxu0 %v3989_v45 }
 0x749   :  { %3287 = vmatprep.subr.bf16.mxu0 %v3625_v3 }
 0x74c   :  { %3289 = vmatpush3.bf16.msra.mxu0 %v4015_v57 }
 0x74d   :  { %3290 = vmatprep.subr.bf16.mxu0 %v3625_v3 }
 0x750   :  { %3292 = vmatpush3.bf16.msra.mxu0 %v4027_v60 }
 0x751   :  { %3293 = vmatprep.subr.bf16.mxu0 %v3625_v3 }
 0x754   :  { %3295 = vmatpush3.bf16.msra.mxu0 %v4039_v63 }
 0x755   :  { %3296 = vmatprep.subr.bf16.mxu0 %v3625_v3 }
 0x758   :  { %3298 = vmatpush3.bf16.msra.mxu0 %v4051_v2 }
 0x759   :  { %3323 = vmatprep.subr.bf16.mxu0 %v3625_v3 }
 0x80e   :  { %v863_v24 = vpop.f32.mrb[8].mxu0 }
 0x80f   :  { %v867_v26 = vadd.f32 %v863_v24, %v796_v23  ;;  %v2614_v27 = vpop.f32.mrb[9].mxu0  ;;  %v4220_v24 = vld [vmem:[#allocation2 + $0x10] sm:$0xff] }
 0x810   :  { %v1937_v27 = vld [vmem:[%s4429_s2 + $0xa] sm:$0x3]  ;;  %s1454_s2 = sld [smem:[#allocation3]] }
 0x811   :  { %3585 = vtanh.f32 %v867_v26  ;;  %v4224_v26 = vpack.c.bf16 %v4220_v24, %v4220_v24 }
 0x81b   :  { %v4088_v28 = vpop.eup %3585 }
 0x81c   :  { %2648 = vmatmul.mubr.f32.vlgmr.msra.gmra.mrb[8].mxu1 %v4088_v28 }
 0x81d   :  { %3301 = vmatpush3.bf16.msra.mxu1 %v3963_v37  ;;  %2717 = vmatprep.mubr.msk.f32.mxu1 %vm3626_vm0, %v3627_v6 }
 0x81e   :  { %3302 = vmatprep.subr.bf16.mxu1 %v3625_v3 }
 0x821   :  { %3304 = vmatpush3.bf16.msra.mxu1 %v3969_v39 }
 0x822   :  { %3305 = vmatprep.subr.bf16.mxu1 %v3625_v3 }
 0x825   :  { %3307 = vmatpush3.bf16.msra.mxu1 %v3979_v42 }
 0x826   :  { %3308 = vmatprep.subr.bf16.mxu1 %v3625_v3 }
 0x829   :  { %3310 = vmatpush3.bf16.msra.mxu1 %v3989_v45 }
 0x82a   :  { %3311 = vmatprep.subr.bf16.mxu1 %v3625_v3 }
 0x82d   :  { %3313 = vmatpush3.bf16.msra.mxu1 %v4015_v57 }
 0x82e   :  { %3314 = vmatprep.subr.bf16.mxu1 %v3625_v3 }
 0x831   :  { %3316 = vmatpush3.bf16.msra.mxu1 %v4027_v60 }
 0x832   :  { %3317 = vmatprep.subr.bf16.mxu1 %v3625_v3 }
 0x835   :  { %3319 = vmatpush3.bf16.msra.mxu1 %v4039_v63 }
 0x836   :  { %3320 = vmatprep.subr.bf16.mxu1 %v3625_v3 }
 0x839   :  { %3322 = vmatpush3.bf16.msra.mxu1 %v4051_v2 }
 0x83a   :  { %3347 = vmatprep.subr.bf16.mxu1 %v3625_v3 }
 0x8ef   :  { %v937_v7 = vpop.f32.mrb[8].mxu1 }
 0x8f0   :  { %v941_v10 = vadd.f32 %v1933_v4, %v937_v7  ;;  %v2649_v13 = vpop.f32.mrb[9].mxu1 }
 0x8f2   :  { %3587 = vtanh.f32 %v941_v10 }
 0x8fc   :  { %v4112_v16 = vpop.eup %3587 }
 0x8fd   :  { %2683 = vmatmul.mubr.f32.vlgmr.msra.gmra.mrb[10].mxu0 %v4112_v16  ;;  %v1240_v30 = vrot.slane %v4112_v16, 7 }
 0x8fe   :  { %3325 = vmatpush3.bf16.msra.mxu0 %v3963_v37  ;;  %2752 = vmatprep.mubr.msk.f32.mxu0 %vm3626_vm0, %v3627_v6 }
 0x8ff   :  { %3326 = vmatprep.subr.bf16.mxu0 %v3625_v3  ;;  %v1265_v33 = vsel %vm723_vm2, %v4088_v28, %v1240_v30 }
 0x902   :  { %3328 = vmatpush3.bf16.msra.mxu0 %v3969_v39 }
 0x903   :  { %3329 = vmatprep.subr.bf16.mxu0 %v3625_v3 }
 0x906   :  { %3331 = vmatpush3.bf16.msra.mxu0 %v3979_v42 }
 0x907   :  { %3332 = vmatprep.subr.bf16.mxu0 %v3625_v3 }
 0x90a   :  { %3334 = vmatpush3.bf16.msra.mxu0 %v3989_v45 }
 0x90b   :  { %3335 = vmatprep.subr.bf16.mxu0 %v3625_v3 }
 0x90e   :  { %3337 = vmatpush3.bf16.msra.mxu0 %v4015_v57 }
 0x90f   :  { %3338 = vmatprep.subr.bf16.mxu0 %v3625_v3 }
 0x912   :  { %3340 = vmatpush3.bf16.msra.mxu0 %v4027_v60 }
 0x913   :  { %3341 = vmatprep.subr.bf16.mxu0 %v3625_v3 }
 0x916   :  { %3343 = vmatpush3.bf16.msra.mxu0 %v4039_v63 }
 0x917   :  { %3344 = vmatprep.subr.bf16.mxu0 %v3625_v3 }
 0x91a   :  { %3346 = vmatpush3.bf16.msra.mxu0 %v4051_v2 }
 0x9d0   :  { %v1011_v22 = vpop.f32.mrb[10].mxu0 }
 0x9d1   :  { %v1015_v25 = vadd.f32 %v1934_v19, %v1011_v22  ;;  %v2684_v29 = vpop.f32.mrb[11].mxu0 }
 0x9d2   :  { %v1257_v29 = vrot.slane %v4112_v16, 2  ;;  %v1541_v16 = vld [vmem:[#allocation2 + $0x88] sm:$0xff] }
 0x9d3   :  { %3589 = vtanh.f32 %v1015_v25  ;;  %v1255_v25 = vrot.slane %v4088_v28, 3 }
 0x9dd   :  { %v3590_v31 = vpop.eup %3589 }
 0x9de   :  { %2718 = vmatmul.mubr.f32.vlgmr.msra.gmra.mrb[10].mxu1 %v3590_v31  ;;  %v1243_v32 = vrot.slane %v3590_v31, 6 }
 0x9df   :  { %3349 = vmatpush3.bf16.msra.mxu1 %v3963_v37  ;;  %2787 = vmatprep.mubr.msk.f32.mxu1 %vm3626_vm0, %v3627_v6 }
 0x9e0   :  { %3350 = vmatprep.subr.bf16.mxu1 %v3625_v3  ;;  %v1266_v34 = vsel %vm725_vm1, %v1265_v33, %v1243_v32 }
 0x9e3   :  { %3352 = vmatpush3.bf16.msra.mxu1 %v3969_v39  ;;  %v1259_v39 = vrot.slane %v3590_v31, 1 }
 0x9e4   :  { %3353 = vmatprep.subr.bf16.mxu1 %v3625_v3 }
 0x9e7   :  { %3355 = vmatpush3.bf16.msra.mxu1 %v3979_v42 }
 0x9e8   :  { %3356 = vmatprep.subr.bf16.mxu1 %v3625_v3 }
 0x9eb   :  { %3358 = vmatpush3.bf16.msra.mxu1 %v3989_v45  ;;  %v1276_v45 = vld [vmem:[%s4432_s5 + $0x8] sm:$0xff] }
 0x9ec   :  { %3359 = vmatprep.subr.bf16.mxu1 %v3625_v3  ;;  %v3371_v47 = vpack.c.bf16 %v1276_v45, %v1275_v44 }
 0x9ee   :  { %3372 = vmatprep.subr.bf16.mxu0 %v3371_v47 }
 0x9ef   :  { %3361 = vmatpush3.bf16.msra.mxu1 %v4015_v57 }
 0x9f0   :  { %3362 = vmatprep.subr.bf16.mxu1 %v3625_v3 }
 0x9f3   :  { %3364 = vmatpush3.bf16.msra.mxu1 %v4027_v60  ;;  %v1369_v60 = vld [vmem:[#allocation2 + $0x8] sm:$0xff] }
 0x9f4   :  { %3365 = vmatprep.subr.bf16.mxu1 %v3625_v3  ;;  %v3404_v62 = vpack.c.bf16 %v1369_v60, %v4062_v20  ;;  %v1290_v20 = vld [vmem:[%s4432_s5 + $0x78] sm:$0xff] }
 0x9f5   :  { %v3399_v23 = vpack.c.bf16 %v1290_v20, %v1289_v18  ;;  %v1744_v18 = vld [vmem:[%s4434_s7 + $0x30] sm:$0xff]  ;;  %v1745_v20 = vld [vmem:[%s4434_s7 + $0x38] sm:$0xff] }
 0x9f7   :  { %3367 = vmatpush3.bf16.msra.mxu1 %v4039_v63 }
 0x9f8   :  { %3368 = vmatprep.subr.bf16.mxu1 %v3625_v3 }
 0x9fb   :  { %3370 = vmatpush3.bf16.msra.mxu1 %v4051_v2 }
 0x9fc   :  { %3403 = vmatprep.subr.bf16.mxu1 %v3625_v3 }
 0xab1   :  { %v1085_v36 = vpop.f32.mrb[10].mxu1 }
 0xab2   :  { %v1089_v37 = vadd.f32 %v1935_v35, %v1085_v36  ;;  %v2719_v38 = vpop.f32.mrb[11].mxu1  ;;  %v3452_v36 = vpack.c.bf16 %v1541_v16, %v4065_v21  ;;  %v1366_v21 = vlaneseq  ;;  %v1724_v16 = vld [vmem:[%s4433_s6 + $0x10] sm:$0xff] }
 0xab4   :  { %3591 = vtanh.f32 %v1089_v37 }
 0xabe   :  { %v3592_v40 = vpop.eup %3591 }
 0xabf   :  { %2753 = vmatmul.mubr.f32.vlgmr.msra.gmra.mrb[12].mxu0 %v3592_v40  ;;  %v1246_v41 = vrot.slane %v3592_v40, 5  ;;  %v1272_v42 = vsel %vm723_vm2, %v1259_v39, %v3592_v40  ;;  %v1367_v39 = vand.u32 127, %v1366_v21  ;;  %v1455_v40 = vstv %s1454_s2  ;;  %v1728_v21 = vld [vmem:[%s4433_s6 + $0x30] sm:$0xff] }
 0xac0   :  { %3374 = vmatpush3.bf16.msra.mxu0 %v3371_v47 }
 0xac1   :  { %v1267_v43 = vsel %vm727_vm3, %v1266_v34, %v1246_v41  ;;  %3376 = vmatprep.subr.bf16.mxu0 %v3375_v49  ;;  %vm1456_vm8 = vcmp.lt.s32.totalorder %v1367_v39, %v1455_v40 }
 0xac4   :  { %3378 = vmatpush3.bf16.msra.mxu0 %v3375_v49 }
 0xac5   :  { %3380 = vmatprep.subr.bf16.mxu0 %v3379_v52 }
 0xac8   :  { %3382 = vmatpush3.bf16.msra.mxu0 %v3379_v52 }
 0xac9   :  { %3384 = vmatprep.subr.bf16.mxu0 %v3383_v55 }
 0xacc   :  { %3386 = vmatpush3.bf16.msra.mxu0 %v3383_v55  ;;  %v1633_v55 = vstv %s1938_s28 }
 0xacd   :  { %3388 = vmatprep.subr.bf16.mxu0 %v3387_v9  ;;  %vm1634_vm9 = vcmp.lt.s32.totalorder %v1367_v39, %v1633_v55  ;;  %v1729_v39 = vld [vmem:[%s4433_s6 + $0x38] sm:$0xff] }
 0xace   :  { %v3543_v40 = vpack.c.bf16 %v1729_v39, %v1728_v21 }
 0xad0   :  { %3390 = vmatpush3.bf16.msra.mxu0 %v3387_v9  ;;  %v1741_v9 = vld [vmem:[%s4434_s7 + $0x18] sm:$0xff] }
 0xad1   :  { %v3503_v12 = vpack.c.bf16 %v1741_v9, %v1740_v8 }
 0xb92   :  { %v1159_v57 = vpop.f32.mrb[12].mxu0 }
 0xb93   :  { %v1163_v58 = vadd.f32 %v1936_v56, %v1159_v57  ;;  %v2754_v59 = vpop.f32.mrb[13].mxu0 }
 0xb95   :  { %3593 = vtanh.f32 %v1163_v58 }
 0xb9f   :  { %v3594_v61 = vpop.eup %3593 }
 0xba0   :  { %2788 = vmatmul.mubr.f32.vlgmr.msra.gmra.mrb[12].mxu1 %v3594_v61  ;;  %v1249_v63 = vrot.slane %v3594_v61, 4  ;;  %v1261_v0 = vrot.slane %v3594_v61, 7 }
 0xba1   :  { %3405 = vmatpush3.bf16.xpose.msra.mxu1 %v3404_v62  ;;  %2857 = vmatprep.mubr.msk.f32.mxu1 %vm3626_vm0, %v3627_v6  ;;  %v1286_v6 = vld [vmem:[%s4432_s5 + $0x58] sm:$0xff] }
 0xba2   :  { %v1268_v1 = vsel %vm729_vm4, %v1267_v43, %v1249_v63  ;;  %v1273_v2 = vsel %vm725_vm1, %v1272_v42, %v1261_v0  ;;  %3406 = vmatprep.subr.bf16.mxu1 %v3625_v3  ;;  %v3391_v14 = vpack.c.bf16 %v1286_v6, %v1285_v11  ;;  %v1738_v0 = vld [vmem:[%s4434_s7] sm:$0xff] }
 0xba4   :  { %3392 = vmatprep.subr.bf16.mxu0 %v3391_v14 }
 0xba5   :  { %3394 = vmatpush3.bf16.msra.mxu0 %v3391_v14  ;;  %v1742_v14 = vld [vmem:[%s4434_s7 + $0x20] sm:$0xff] }
 0xba6   :  { %3396 = vmatprep.subr.bf16.mxu0 %v3395_v17 }
 0xba9   :  { %3398 = vmatpush3.bf16.msra.mxu0 %v3395_v17  ;;  %3408 = vmatpush3.bf16.xpose.msra.mxu1 %v4224_v26  ;;  %v3507_v17 = vpack.c.bf16 %v1743_v15, %v1742_v14 }
 0xbaa   :  { %3400 = vmatprep.subr.bf16.mxu0 %v3399_v23  ;;  %3409 = vmatprep.subr.bf16.mxu1 %v3625_v3 }
 0xbad   :  { %3402 = vmatpush3.bf16.msra.mxu0 %v3399_v23  ;;  %v3511_v23 = vpack.c.bf16 %v1745_v20, %v1744_v18 }
 0xbae   :  { %3427 = vmatprep.subr.bf16.mxu0 %v3625_v3 }
 0xbb1   :  { %3411 = vmatpush3.bf16.xpose.msra.mxu1 %v4224_v26 }
 0xbb2   :  { %3412 = vmatprep.subr.bf16.mxu1 %v3625_v3 }
 0xbb9   :  { %3414 = vmatpush3.bf16.xpose.msra.mxu1 %v4224_v26 }
 0xbba   :  { %3415 = vmatprep.subr.bf16.mxu1 %v3625_v3 }
 0xbc1   :  { %3417 = vmatpush3.bf16.xpose.msra.mxu1 %v4224_v26 }
 0xbc2   :  { %3418 = vmatprep.subr.bf16.mxu1 %v3625_v3 }
 0xbc9   :  { %3420 = vmatpush3.bf16.xpose.msra.mxu1 %v4224_v26 }
 0xbca   :  { %3421 = vmatprep.subr.bf16.mxu1 %v3625_v3 }
 0xbd1   :  { %3423 = vmatpush3.bf16.xpose.msra.mxu1 %v4224_v26 }
 0xbd2   :  { %3424 = vmatprep.subr.bf16.mxu1 %v3625_v3 }
 0xbd9   :  { %3426 = vmatpush3.bf16.xpose.msra.mxu1 %v4224_v26 }
 0xbda   :  { %3475 = vmatprep.subr.bf16.mxu1 %v3625_v3 }
 0xc73   :  { %v1233_v4 = vpop.f32.mrb[12].mxu1 }
 0xc74   :  { %v1237_v7 = vadd.f32 %v1937_v27, %v1233_v4  ;;  %v2789_v10 = vpop.f32.mrb[13].mxu1  ;;  %v1748_v4 = vld [vmem:[%s4434_s7 + $0x50] sm:$0xff] }
 0xc76   :  { %3595 = vtanh.f32 %v1237_v7  ;;  %v1749_v7 = vld [vmem:[%s4434_s7 + $0x58] sm:$0xff] }
 0xc77   :  { %v3519_v10 = vpack.c.bf16 %v1749_v7, %v1748_v4 }
 0xc80   :  { %v3596_v13 = vpop.eup %3595 }
 0xc81   :  { %v1252_v19 = vrot.slane %v3596_v13, 3  ;;  %v1263_v22 = vrot.slane %v3596_v13, 6  ;;  %v1750_v13 = vld [vmem:[%s4434_s7 + $0x60] sm:$0xff] }
 0xc83   :  { %v1269_v30 = vsel %vm731_vm5, %v1268_v1, %v1252_v19  ;;  %v4247_v31 = vsel %vm727_vm3, %v1273_v2, %v1263_v22  ;;  %v1739_v1 = vld [vmem:[%s4434_s7 + $0x8] sm:$0xff] }
 0xc84   :  { %v1270_v32 = vsel %vm733_vm6, %v1269_v30, %v1255_v25  ;;  %v3499_v2 = vpack.c.bf16 %v1739_v1, %v1738_v0  ;;  %v1751_v19 = vld [vmem:[%s4434_s7 + $0x68] sm:$0xff]  ;;  %v1752_v25 = vld [vmem:[%s4434_s7 + $0x70] sm:$0xff] }
 0xc85   :  { %v4251_v33 = vsel %vm735_vm7, %v1270_v32, %v1257_v29  ;;  %v3523_v22 = vpack.c.bf16 %v1751_v19, %v1750_v13  ;;  %v1753_v29 = vld [vmem:[%s4434_s7 + $0x78] sm:$0xff]  ;;  %v1722_v32 = vld [vmem:[%s4433_s6] sm:$0xff] }
 0xc86   :  { %2822 = vmatprep.mubr.f32.mxu0 %v4251_v33  ;;  %v3527_v30 = vpack.c.bf16 %v1753_v29, %v1752_v25 }
 0xc87   :  { %2823 = vmatmul.mubr.f32.vlgmr.msra.gmra.mrb[14].mxu0 %v4247_v31 }
 0xc88   :  { %3429 = vmatpush3.bf16.msra.mxu0 %v3404_v62  ;;  %2892 = vmatprep.mubr.msk.f32.mxu0 %vm3626_vm0, %v4220_v24 }
 0xc89   :  { %3430 = vmatprep.subr.bf16.mxu0 %v3625_v3 }
 0xc8c   :  { %3432 = vmatpush3.bf16.msra.mxu0 %v4224_v26 }
 0xc8d   :  { %3433 = vmatprep.subr.bf16.mxu0 %v3625_v3 }
 0xc90   :  { %3435 = vmatpush3.bf16.msra.mxu0 %v4224_v26 }
 0xc91   :  { %3436 = vmatprep.subr.bf16.mxu0 %v3625_v3 }
 0xc94   :  { %3438 = vmatpush3.bf16.msra.mxu0 %v4224_v26 }
 0xc95   :  { %3439 = vmatprep.subr.bf16.mxu0 %v3625_v3 }
 0xc98   :  { %3441 = vmatpush3.bf16.msra.mxu0 %v4224_v26 }
 0xc99   :  { %3442 = vmatprep.subr.bf16.mxu0 %v3625_v3 }
 0xc9c   :  { %3444 = vmatpush3.bf16.msra.mxu0 %v4224_v26 }
 0xc9d   :  { %3445 = vmatprep.subr.bf16.mxu0 %v3625_v3 }
 0xca0   :  { %3447 = vmatpush3.bf16.msra.mxu0 %v4224_v26 }
 0xca1   :  { %3448 = vmatprep.subr.bf16.mxu0 %v3625_v3 }
 0xca4   :  { %3450 = vmatpush3.bf16.msra.mxu0 %v4224_v26 }
 0xca5   :  { %3451 = vmatprep.subr.bf16.mxu0 %v3625_v3 }
 0xd5a   :  { %v2824_v28 = vpop.f32.mrb[14].mxu0 }
 0xd5b   :  { %v1559_v34 = vrot.slane %v2824_v28, 6  ;;  %v1357_v35 = vpop.f32.mrb[15].mxu0 }
 0xd5c   :  { %v1558_v37 = vrot.slane %v1357_v35, 6  ;;  %2858 = vmatmul.mubr.f32.vlgmr.msra.gmra.mrb[14].mxu1 %v1357_v35 }
 0xd5d   :  { %3477 = vmatpush3.bf16.msra.mxu1 %v3452_v36  ;;  %2962 = vmatprep.mubr.msk.f32.mxu1 %vm3626_vm0, %v4220_v24 }
 0xd5e   :  { %v1560_v38 = vsel %vm725_vm1, %v1558_v37, %v1559_v34  ;;  %3478 = vmatprep.subr.bf16.mxu1 %v3625_v3  ;;  %v1725_v34 = vld [vmem:[%s4433_s6 + $0x18] sm:$0xff]  ;;  %v1727_v37 = vld [vmem:[%s4433_s6 + $0x28] sm:$0xff] }
 0xd5f   :  { %v3535_v35 = vpack.c.bf16 %v1725_v34, %v1724_v16 }
 0xd61   :  { %3480 = vmatpush3.bf16.msra.mxu1 %v4224_v26 }
 0xd62   :  { %3481 = vmatprep.subr.bf16.mxu1 %v3625_v3 }
 0xd65   :  { %3483 = vmatpush3.bf16.msra.mxu1 %v4224_v26 }
 0xd66   :  { %3484 = vmatprep.subr.bf16.mxu1 %v3625_v3 }
 0xd69   :  { %3486 = vmatpush3.bf16.msra.mxu1 %v4224_v26 }
 0xd6a   :  { %3487 = vmatprep.subr.bf16.mxu1 %v3625_v3 }
 0xd6d   :  { %3489 = vmatpush3.bf16.msra.mxu1 %v4224_v26 }
 0xd6e   :  { %3490 = vmatprep.subr.bf16.mxu1 %v3625_v3 }
 0xd71   :  { %3492 = vmatpush3.bf16.msra.mxu1 %v4224_v26 }
 0xd72   :  { %3493 = vmatprep.subr.bf16.mxu1 %v3625_v3 }
 0xd75   :  { %3495 = vmatpush3.bf16.msra.mxu1 %v4224_v26 }
 0xd76   :  { %3496 = vmatprep.subr.bf16.mxu1 %v3625_v3 }
 0xd79   :  { %3498 = vmatpush3.bf16.msra.mxu1 %v4224_v26 }
 0xd7a   :  { %3500 = vmatprep.subr.bf16.mxu1 %v3499_v2 }
 0xe2f   :  { %v1450_v41 = vpop.f32.mrb[14].mxu1 }
 0xe30   :  { %v1457_v42 = vsel %vm1456_vm8, %v1450_v41, -1e+30  ;;  %v2859_v43 = vpop.f32.mrb[15].mxu1  ;;  %v1730_v41 = vld [vmem:[%s4433_s6 + $0x40] sm:$0xff] }
 0xe31   :  { %v1458_v44 = vsel %vm733_vm6, %v1457_v42, -inf  ;;  %v1732_v43 = vld [vmem:[%s4433_s6 + $0x50] sm:$0xff] }
 0xe32   :  { %1459 = vmax.xlane.f32.xlu0 %v1458_v44  ;;  %v1733_v44 = vld [vmem:[%s4433_s6 + $0x58] sm:$0xff] }
 0xebf   :  { %v1460_v45 = vpop.xlane.xlu0 %1459 }
 0xec0   :  { %v1461_v46 = vsub.f32 %v1457_v42, %v1460_v45  ;;  %v3551_v45 = vpack.c.bf16 %v1733_v44, %v1732_v43 }
 0xec2   :  { %v1462_v47 = vmul.f32 1.442695, %v1461_v46  ;;  %v1734_v46 = vld [vmem:[%s4433_s6 + $0x60] sm:$0xff] }
 0xec4   :  { %3597 = vpow2.f32 %v1462_v47  ;;  %v1735_v47 = vld [vmem:[%s4433_s6 + $0x68] sm:$0xff] }
 0xece   :  { %v3598_v48 = vpop.eup %3597 }
 0xecf   :  { %v1464_v49 = vsel %vm733_vm6, %v3598_v48, 0.0 }
 0xed0   :  { %1465 = vadd.xlane.f32.xlu0 %v1464_v49  ;;  %v1736_v49 = vld [vmem:[%s4433_s6 + $0x70] sm:$0xff] }
 0xf5d   :  { %v1466_v50 = vpop.xlane.xlu0 %1465 }
 0xf5e   :  { %3599 = vrcp.f32 %v1466_v50  ;;  %v1737_v50 = vld [vmem:[%s4433_s6 + $0x78] sm:$0xff] }
 0xf68   :  { %v3600_v51 = vpop.eup %3599 }
 0xf69   :  { %v1468_v52 = vmul.f32 %v3600_v51, %v3598_v48  ;;  %v3555_v48 = vpack.c.bf16 %v1735_v47, %v1734_v46  ;;  %v3559_v51 = vpack.c.bf16 %v1737_v50, %v1736_v49 }
 0xf6b   :  { %2893 = vmatmul.mubr.f32.vlgmr.msra.gmra.mrb[16].mxu0 %v1468_v52  ;;  %1539 = vst [vmem:[%s4437_s10] sm:$0x3f] %v1468_v52 }
 0xf6c   :  { %3453 = vmatpush3.bf16.xpose.msra.mxu0 %v3452_v36  ;;  %2927 = vmatprep.mubr.msk.f32.mxu0 %vm3626_vm0, %v4220_v24  ;;  %v1746_v24 = vld [vmem:[%s4434_s7 + $0x40] sm:$0xff] }
 0xf6d   :  { %3454 = vmatprep.subr.bf16.mxu0 %v3625_v3  ;;  %v1726_v36 = vld [vmem:[%s4433_s6 + $0x20] sm:$0xff] }
 0xf74   :  { %3456 = vmatpush3.bf16.xpose.msra.mxu0 %v4224_v26 }
 0xf75   :  { %3457 = vmatprep.subr.bf16.mxu0 %v3625_v3 }
 0xf7c   :  { %3459 = vmatpush3.bf16.xpose.msra.mxu0 %v4224_v26 }
 0xf7d   :  { %3460 = vmatprep.subr.bf16.mxu0 %v3625_v3 }
 0xf84   :  { %3462 = vmatpush3.bf16.xpose.msra.mxu0 %v4224_v26 }
 0xf85   :  { %3463 = vmatprep.subr.bf16.mxu0 %v3625_v3 }
 0xf8c   :  { %3465 = vmatpush3.bf16.xpose.msra.mxu0 %v4224_v26 }
 0xf8d   :  { %3466 = vmatprep.subr.bf16.mxu0 %v3625_v3 }
 0xf94   :  { %3468 = vmatpush3.bf16.xpose.msra.mxu0 %v4224_v26 }
 0xf95   :  { %3469 = vmatprep.subr.bf16.mxu0 %v3625_v3 }
 0xf9c   :  { %3471 = vmatpush3.bf16.xpose.msra.mxu0 %v4224_v26 }
 0xf9d   :  { %3472 = vmatprep.subr.bf16.mxu0 %v3625_v3 }
 0xfa4   :  { %3474 = vmatpush3.bf16.xpose.msra.mxu0 %v4224_v26  ;;  %v1747_v26 = vld [vmem:[%s4434_s7 + $0x48] sm:$0xff] }
 0xfa5   :  { %v3515_v27 = vpack.c.bf16 %v1747_v26, %v1746_v24 }
 0xfab   :  { %2928 = vmatmul.mubr.f32.vlgmr.msra.gmra.mrb[18].mxu0 %v1560_v38  ;;  %v3539_v38 = vpack.c.bf16 %v1727_v37, %v1726_v36 }
0x103e   :  { %v4311_v53 = vpop.f32.mrb[16].mxu0 }
0x103f   :  { %v2894_v54 = vpop.f32.mrb[17].mxu0 }
0x107e   :  { %v1628_v56 = vpop.f32.mrb[18].mxu0 }
0x107f   :  { %v1635_v57 = vsel %vm1634_vm9, %v1628_v56, -1e+30  ;;  %v2929_v58 = vpop.f32.mrb[19].mxu0 }
0x1080   :  { %v1636_v59 = vsel %vm733_vm6, %v1635_v57, -inf }
0x1081   :  { %1637 = vmax.xlane.f32.xlu1 %v1636_v59 }
0x110e   :  { %v1638_v60 = vpop.xlane.xlu1 %1637 }
0x110f   :  { %v1639_v61 = vsub.f32 %v1635_v57, %v1638_v60  ;;  %v1939_v57 = vld [vmem:[%s4435_s8] ss:$0 sm:$0xff] }
0x1111   :  { %v1640_v62 = vmul.f32 1.442695, %v1639_v61 }
0x1113   :  { %3601 = vpow2.f32 %v1640_v62 }
0x111d   :  { %v3602_v3 = vpop.eup %3601 }
0x111e   :  { %v1642_v63 = vsel %vm733_vm6, %v3602_v3, 0.0 }
0x111f   :  { %1643 = vadd.xlane.f32.xlu1 %v1642_v63 }
0x11ac   :  { %v1644_v5 = vpop.xlane.xlu1 %1643 }
0x11ad   :  { %3603 = vrcp.f32 %v1644_v5 }
0x11b7   :  { %v3604_v11 = vpop.eup %3603 }
0x11b8   :  { %v1646_v6 = vmul.f32 %v3604_v11, %v3602_v3 }
0x11ba   :  { %2963 = vmatmul.mubr.f32.vlgmr.msra.gmra.mrb[16].mxu1 %v1646_v6  ;;  %1717 = vst [vmem:[%s4437_s10 + $0x6] sm:$0x3f] %v1646_v6 }
0x11bb   :  { %3502 = vmatpush3.bf16.msra.mxu1 %v3499_v2  ;;  %2997 = vmatprep.mubr.f32.mxu1 %v4251_v33  ;;  %v1723_v33 = vld [vmem:[%s4433_s6 + $0x8] sm:$0xff] }
0x11bc   :  { %3504 = vmatprep.subr.bf16.mxu1 %v3503_v12  ;;  %v3531_v28 = vpack.c.bf16 %v1723_v33, %v1722_v32 }
0x11bf   :  { %3506 = vmatpush3.bf16.msra.mxu1 %v3503_v12 }
0x11c0   :  { %3508 = vmatprep.subr.bf16.mxu1 %v3507_v17 }
0x11c3   :  { %3510 = vmatpush3.bf16.msra.mxu1 %v3507_v17 }
0x11c4   :  { %3512 = vmatprep.subr.bf16.mxu1 %v3511_v23 }
0x11c7   :  { %3514 = vmatpush3.bf16.msra.mxu1 %v3511_v23 }
0x11c8   :  { %3516 = vmatprep.subr.bf16.mxu1 %v3515_v27 }
0x11cb   :  { %3518 = vmatpush3.bf16.msra.mxu1 %v3515_v27 }
0x11cc   :  { %3520 = vmatprep.subr.bf16.mxu1 %v3519_v10 }
0x11cf   :  { %3522 = vmatpush3.bf16.msra.mxu1 %v3519_v10 }
0x11d0   :  { %3524 = vmatprep.subr.bf16.mxu1 %v3523_v22 }
0x11d3   :  { %3526 = vmatpush3.bf16.msra.mxu1 %v3523_v22 }
0x11d4   :  { %3528 = vmatprep.subr.bf16.mxu1 %v3527_v30 }
0x11d7   :  { %3530 = vmatpush3.bf16.msra.mxu1 %v3527_v30 }
0x11d8   :  { %3532 = vmatprep.subr.bf16.mxu1 %v3531_v28 }
0x11da   :  { %2998 = vmatmul.mubr.f32.vlgmr.msra.gmra.mrb[18].mxu1 %v4247_v31  ;;  %v1731_v31 = vld [vmem:[%s4433_s6 + $0x48] sm:$0xff] }
0x11db   :  { %3534 = vmatpush3.bf16.msra.mxu1 %v3531_v28  ;;  %v3547_v42 = vpack.c.bf16 %v1731_v31, %v1730_v41 }
0x11dc   :  { %3536 = vmatprep.subr.bf16.mxu1 %v3535_v35 }
0x11df   :  { %3538 = vmatpush3.bf16.msra.mxu1 %v3535_v35 }
0x11e0   :  { %3540 = vmatprep.subr.bf16.mxu1 %v3539_v38 }
0x11e3   :  { %3542 = vmatpush3.bf16.msra.mxu1 %v3539_v38 }
0x11e4   :  { %3544 = vmatprep.subr.bf16.mxu1 %v3543_v40 }
0x11e7   :  { %3546 = vmatpush3.bf16.msra.mxu1 %v3543_v40 }
0x11e8   :  { %3548 = vmatprep.subr.bf16.mxu1 %v3547_v42 }
0x11eb   :  { %3550 = vmatpush3.bf16.msra.mxu1 %v3547_v42 }
0x11ec   :  { %3552 = vmatprep.subr.bf16.mxu1 %v3551_v45 }
0x11ef   :  { %3554 = vmatpush3.bf16.msra.mxu1 %v3551_v45 }
0x11f0   :  { %3556 = vmatprep.subr.bf16.mxu1 %v3555_v48 }
0x11f3   :  { %3558 = vmatpush3.bf16.msra.mxu1 %v3555_v48 }
0x11f4   :  { %3560 = vmatprep.subr.bf16.mxu1 %v3559_v51 }
0x11f7   :  { %3562 = vmatpush3.bf16.msra.mxu1 %v3559_v51 }
0x128d   :  { %v1713_v52 = vpop.f32.mrb[16].mxu1 }
0x128e   :  { %v1719_v54 = vrot.slane %v1713_v52, 2  ;;  %v2964_v55 = vpop.f32.mrb[17].mxu1 }
0x1290   :  { %v1721_v56 = vsel %vm733_vm6, %v4311_v53, %v1719_v54 }
0x1291   :  { %3032 = vmatprep.mubr.f32.mxu1 %v1721_v56 }
0x1292   :  { %3033 = vmatmul.mubr.f32.vlgmr.msra.gmra.mrb[18].mxu1 %v1719_v54 }
0x1365   :  { %v3034_v58 = vpop.f32.mrb[18].mxu1 }
0x1366   :  { %v1912_v59 = vadd.f32 %v3034_v58, %v1939_v57  ;;  %v1895_v60 = vpop.f32.mrb[19].mxu1 }
0x1367   :  { %v1911_v61 = vadd.f32 %v1939_v57, %v1895_v60 }
0x1368   :  { %3605 = vtanh.f32 %v1912_v59 }
0x1369   :  { %3607 = vtanh.f32 %v1911_v61 }
0x1372   :  { %v3606_v62 = vpop.eup %3605 }
0x1373   :  { %v3608_v3 = vpop.eup %3607  ;;  %1916 = vst [vmem:[%s4436_s9 + $0x8] sm:$0xf] %v3606_v62 }
0x1374   :  { %1915 = vst [vmem:[%s4436_s9] sm:$0xff] %v3608_v3 }
0x1375   :  { %1925 = vsyncpa [#allocation4], 1 }

</bundles_post_ra>
